<compile_context>
chip_gen: v5e
topology: v5e:2x2
jax: 0.10.0
libtpu: 0.0.40
codegen_flags: <defaults>
</compile_context>

<pallas_src>
import math

import jax
import jax.numpy as jnp
from jax import lax
from jax.experimental import pallas as pl
from jax.experimental.pallas import tpu as pltpu


def _vmem_capacity_bytes():
    """Physical VMEM per core; safe fallback if the query is unavailable."""
    try:
        info = pltpu.get_tpu_info()
        cap = int(getattr(info, "vmem_capacity_bytes", 0))
        if cap > 0:
            return cap
    except Exception:
        pass
    return 128 << 20


def _make_lstm_kernel(num_layers, hidden_size, seq_len, batch_tile, t_chunk,
                      compute_dtype):
    """Builds a kernel closing over the static configuration."""
    H = hidden_size
    T = seq_len
    Bt = batch_tile
    Tc = t_chunk
    n_chunks = -(-T // Tc)
    four_h = 4 * H
    full_width_act = four_h <= 128  # below one vreg width, slices save nothing
    has_hid = num_layers > 1

    # Unroll bounded by the per-step live vreg working set (h, c, gates, acts).
    per_step_elems = Bt * (2 * H + 2 * four_h)
    unroll = True if T <= 16 else max(1, min(4, (64 * 1024) // max(1, per_step_elems)))

    def kernel(*refs):
        # refs = [x_ref (T, Bt, Din) compute_dtype,
        #         (w_ih (Din,4H), w_hh (H,4H), b (1,4H)) * num_layers,
        #         w_fc (H, O_pad), b_fc (1, O_pad),
        #         out_ref (Bt, O_pad),
        #         gates (2*Tc*Bt, 4H) f32, [hid (T*Bt, H) if num_layers > 1]]
        x_ref = refs[0]
        layer_refs = refs[1:1 + 3 * num_layers]
        wfc_ref = refs[1 + 3 * num_layers]
        bfc_ref = refs[2 + 3 * num_layers]
        out_ref = refs[3 + 3 * num_layers]
        gates = refs[4 + 3 * num_layers]
        hid = refs[5 + 3 * num_layers] if has_hid else None

        h_last = jnp.zeros((Bt, H), jnp.float32)

        for layer in range(num_layers):
            # Per-layer weights (small for these sizes; kept resident).
            # TODO(synk): for large H / many layers, keep weights in HBM
            # (memory_space=pl.ANY) and prefetch layer l+1 with
            # pltpu.make_async_copy while layer l's recurrence runs; the
            # per-step h@whh could also hold whh in the MXU weight registers
            # via pltpu.matmul_push_rhs / matmul_acc_lhs / matmul_pop.
            wih = layer_refs[3 * layer][...]        # (Din_l, 4H) compute_dtype
            whh = layer_refs[3 * layer + 1][...]    # (H, 4H)    compute_dtype
            bias = layer_refs[3 * layer + 2][...]   # (1, 4H)    f32
            write_hidden = layer < num_layers - 1   # top layer: only h_last needed

            def precompute(c, slot, layer=layer, wih=wih, bias=bias):
                # Input-projection gates for T-chunk c (MXU, f32 accumulation)
                # written into pipeline slot `slot` (all offsets static).
                t0 = c * Tc
                tc = min(Tc, T - t0)
                rows = tc * Bt
                if layer == 0:
                    chunk = x_ref[pl.ds(t0, tc), :, :].reshape(rows, -1)
                else:
                    chunk = hid[pl.ds(t0 * Bt, rows), :].astype(compute_dtype)
                gates[pl.ds(slot * Tc * Bt, rows), :] = (
                    jnp.dot(chunk, wih, preferred_element_type=jnp.float32) + bias)

            # 2-deep chunk pipeline: chunk c+1 projected while chunk c recurs.
            precompute(0, 0)
            carry = (jnp.zeros((Bt, H), jnp.float32),
                     jnp.zeros((Bt, H), jnp.float32))

            for c in range(n_chunks):
                if c + 1 < n_chunks:
                    precompute(c + 1, (c + 1) & 1)
                t0 = c * Tc
                tc = min(Tc, T - t0)
                gbase = (c & 1) * Tc * Bt   # static slot base in gates
                hbase = t0 * Bt             # static global row base in hid

                def step(tl, cr, whh=whh, gbase=gbase, hbase=hbase,
                         write_hidden=write_hidden):
                    h, cst = cr
                    rg = pl.multiple_of(gbase + tl * Bt, Bt)
                    g = gates[pl.ds(rg, Bt), :] + jnp.dot(
                        h.astype(compute_dtype), whh,
                        preferred_element_type=jnp.float32)
                    # Gate columns are host-permuted to (i, f, o, g).
                    if full_width_act:
                        sg = jax.nn.sigmoid(g)
                        g_g = jnp.tanh(g)[:, 3 * H:4 * H]
                    else:
                        sg = jax.nn.sigmoid(g[:, :3 * H])
                        g_g = jnp.tanh(g[:, 3 * H:4 * H])
                    i_g = sg[:, 0 * H:1 * H]
                    f_g = sg[:, 1 * H:2 * H]
                    o_g = sg[:, 2 * H:3 * H]
                    cst = f_g * cst + i_g * g_g
                    h = o_g * jnp.tanh(cst)
                    if write_hidden:
                        rh = pl.multiple_of(hbase + tl * Bt, Bt)
                        hid[pl.ds(rh, Bt), :] = h.astype(hid.dtype)
                    return (h, cst)

                carry = lax.fori_loop(0, tc, step, carry, unroll=unroll)

            h_last = carry[0]

        # TODO(synk): Dropout before fc and LSTM inter-layer dropout are
        # train-only; eval mode == identity, so not applied here.
        out = jnp.dot(h_last.astype(compute_dtype), wfc_ref[...],
                      preferred_element_type=jnp.float32) + bfc_ref[...]
        out_ref[...] = out.astype(out_ref.dtype)

    return kernel


def lstm_model_forward(x, params, *, hidden_size, num_layers,
                       compute_dtype=jnp.bfloat16):
    """x: (B, T, input_size) batch-first (PyTorch layout). Returns (B, output_size) f32."""
    B, T, Din = x.shape
    H = hidden_size
    O = params["w_fc"].shape[1]

    vmem_cap = _vmem_capacity_bytes()
    # 256-row tiles fill the 256-wide MXU on v6e/v7x; keep 128 on small-VMEM parts.
    bt_cap = 256 if vmem_cap >= (96 << 20) else 128

    # Batch padding (sublane multiple of 8); keep >= 2 batch tiles when the
    # padded batch allows it so the single "parallel" axis can split across
    # the two v7x TensorCores (also a VMEM lever).
    B_pad8 = max(8, -(-B // 8) * 8)
    if B_pad8 >= 16:
        Bt = min(bt_cap, max(8, (B_pad8 // 2 // 8) * 8))
    else:
        Bt = B_pad8
    B_pad = -(-B_pad8 // Bt) * Bt
    n_b = B_pad // Bt

    # Lane-dense output: pad fc columns to a multiple of 128, slice outside.
    O_pad = -(-O // 128) * 128

    # T-chunk for the 2-slot pipelined gate precompute: ~512 gate rows per
    # chunk, with the number of statically-unrolled chunks capped at 16.
    Tc = max(1, min(T, max(512 // Bt, -(-T // 16))))

    # Time-major, batch-padded, compute-dtype input (halves DMA bytes for bf16).
    x_tm = jnp.transpose(x, (1, 0, 2)).astype(compute_dtype)
    if B_pad != B:
        x_tm = jnp.pad(x_tm, ((0, 0), (0, B_pad - B), (0, 0)))

    def to_ifog(w):
        # PyTorch gate column order (i, f, g, o) -> (i, f, o, g) so sigmoid
        # covers one contiguous [:, :3H] slice and tanh only [:, 3H:4H].
        return jnp.concatenate(
            [w[..., :2 * H], w[..., 3 * H:4 * H], w[..., 2 * H:3 * H]], axis=-1)

    # Inter-layer hidden scratch dtype: compute_dtype when the batch tile is
    # aligned to the packed-sublane tile, else f32 (keeps stores tile-aligned).
    packing = 4 // jnp.dtype(compute_dtype).itemsize
    hid_dtype = compute_dtype if Bt % (8 * packing) == 0 else jnp.float32

    # Flatten params; matmul operands cast to compute_dtype, biases stay f32.
    flat = []
    in_specs = [pl.BlockSpec((T, Bt, Din), lambda b: (0, b, 0))]
    # TODO(synk): for large H, keep layer weights in HBM (memory_space=pl.ANY)
    # with manual prefetch, and use pipeline_mode=pl.Buffered(1) for these
    # grid-invariant operands to drop the second pipeline buffer.
    for l in range(num_layers):
        din_l = Din if l == 0 else H
        flat += [to_ifog(params[f"w_ih_{l}"]).astype(compute_dtype),
                 to_ifog(params[f"w_hh_{l}"]).astype(compute_dtype),
                 to_ifog(params[f"b_{l}"]).astype(jnp.float32)]
        in_specs += [pl.BlockSpec((din_l, 4 * H), lambda b: (0, 0)),
                     pl.BlockSpec((H, 4 * H), lambda b: (0, 0)),
                     pl.BlockSpec((1, 4 * H), lambda b: (0, 0))]
    w_fc = jnp.pad(params["w_fc"], ((0, 0), (0, O_pad - O))).astype(compute_dtype)
    b_fc = jnp.pad(params["b_fc"], ((0, 0), (0, O_pad - O))).astype(jnp.float32)
    flat += [w_fc, b_fc]
    in_specs += [pl.BlockSpec((H, O_pad), lambda b: (0, 0)),
                 pl.BlockSpec((1, O_pad), lambda b: (0, 0))]

    out_specs = pl.BlockSpec((Bt, O_pad), lambda b: (b, 0))
    out_shape = jax.ShapeDtypeStruct((B_pad, O_pad), jnp.float32)

    scratch_shapes = [pltpu.VMEM((2 * Tc * Bt, 4 * H), jnp.float32)]  # gates (2 slots)
    if num_layers > 1:
        scratch_shapes.append(pltpu.VMEM((T * Bt, H), hid_dtype))     # inter-layer h

    # Size the scoped VMEM limit from the actual resident buffers (headroom x2),
    # capped at ~85% of the physical per-core VMEM of this generation.
    itemsize_w = jnp.dtype(compute_dtype).itemsize
    weight_bytes = 0
    for l in range(num_layers):
        din_l = Din if l == 0 else H
        weight_bytes += (din_l * 4 * H + H * 4 * H) * itemsize_w + 4 * H * 4
    weight_bytes += H * O_pad * itemsize_w + O_pad * 4
    block_bytes = T * Bt * Din * itemsize_w + Bt * O_pad * 4
    scratch_bytes = 2 * Tc * Bt * 4 * H * 4
    if num_layers > 1:
        scratch_bytes += T * Bt * H * jnp.dtype(hid_dtype).itemsize
    total = 2 * (weight_bytes + block_bytes) + scratch_bytes
    vmem_limit = int(min(int(0.85 * vmem_cap), max(32 << 20, 2 * total)))

    kernel = _make_lstm_kernel(num_layers, H, T, Bt, Tc, compute_dtype)
    out = pl.pallas_call(
        kernel,
        out_shape=out_shape,
        grid=(n_b,),
        in_specs=in_specs,
        out_specs=out_specs,
        scratch_shapes=scratch_shapes,
        compiler_params=pltpu.CompilerParams(
            dimension_semantics=("parallel",),
            vmem_limit_bytes=vmem_limit),
    )(x_tm, *flat)
    return out[:B, :O]


def init_params(key, input_size, hidden_size, num_layers, output_size):
    """Deterministic init mimicking PyTorch's uniform(-1/sqrt(H), 1/sqrt(H))."""
    params = {}
    k = 1.0 / math.sqrt(hidden_size)
    keys = jax.random.split(key, 4 * num_layers + 2)
    idx = 0
    for l in range(num_layers):
        din = input_size if l == 0 else hidden_size
        w_ih = jax.random.uniform(keys[idx], (4 * hidden_size, din), jnp.float32, -k, k); idx += 1
        w_hh = jax.random.uniform(keys[idx], (4 * hidden_size, hidden_size), jnp.float32, -k, k); idx += 1
        b_ih = jax.random.uniform(keys[idx], (4 * hidden_size,), jnp.float32, -k, k); idx += 1
        b_hh = jax.random.uniform(keys[idx], (4 * hidden_size,), jnp.float32, -k, k); idx += 1
        params[f"w_ih_{l}"] = w_ih.T                # (din, 4H) pre-transposed, (i,f,g,o) cols
        params[f"w_hh_{l}"] = w_hh.T                # (H, 4H)
        params[f"b_{l}"] = (b_ih + b_hh)[None, :]   # (1, 4H), b_ih + b_hh fused
    w_fc = jax.random.uniform(keys[idx], (output_size, hidden_size), jnp.float32, -k, k); idx += 1
    b_fc = jax.random.uniform(keys[idx], (output_size,), jnp.float32, -k, k)
    params["w_fc"] = w_fc.T          # (H, O)
    params["b_fc"] = b_fc[None, :]   # (1, O)
    return params


def lstm_reference(x, params, hidden_size, num_layers, compute_dtype=jnp.float32):
    """Pure-JAX reference (eval mode) with the same matmul precision policy."""
    B, T, _ = x.shape
    H = hidden_size
    inp = x.astype(jnp.float32)
    h = jnp.zeros((B, H), jnp.float32)
    for l in range(num_layers):
        wih = params[f"w_ih_{l}"].astype(compute_dtype)
        whh = params[f"w_hh_{l}"].astype(compute_dtype)
        b = params[f"b_{l}"]
        h = jnp.zeros((B, H), jnp.float32)
        c = jnp.zeros((B, H), jnp.float32)
        outs = []
        for t in range(T):
            g = (jnp.dot(inp[:, t, :].astype(compute_dtype), wih,
                         preferred_element_type=jnp.float32) + b
                 + jnp.dot(h.astype(compute_dtype), whh,
                           preferred_element_type=jnp.float32))
            i_g = jax.nn.sigmoid(g[:, :H])
            f_g = jax.nn.sigmoid(g[:, H:2 * H])
            g_g = jnp.tanh(g[:, 2 * H:3 * H])
            o_g = jax.nn.sigmoid(g[:, 3 * H:])
            c = f_g * c + i_g * g_g
            h = o_g * jnp.tanh(c)
            outs.append(h)
        inp = jnp.stack(outs, axis=1)
    wfc = params["w_fc"].astype(compute_dtype)
    return (jnp.dot(h.astype(compute_dtype), wfc,
                    preferred_element_type=jnp.float32) + params["b_fc"])


if __name__ == "__main__":
    INPUT_SIZE, HIDDEN_SIZE, NUM_LAYERS, OUTPUT_SIZE = 16, 32, 2, 4
    B, T = 2, 8

    root = jax.random.PRNGKey(0)
    kx, kp = jax.random.split(root)
    x = jax.random.normal(kx, (B, T, INPUT_SIZE), jnp.float32)
    params = init_params(kp, INPUT_SIZE, HIDDEN_SIZE, NUM_LAYERS, OUTPUT_SIZE)

    # f32-compute path: exactness check of the kernel logic (gate permutation,
    # chunk pipeline, accumulation order are all value-preserving in f32).
    out_f32 = lstm_model_forward(x, params, hidden_size=HIDDEN_SIZE,
                                 num_layers=NUM_LAYERS,
                                 compute_dtype=jnp.float32)
    out_f32 = jax.block_until_ready(out_f32)
    ref_f32 = lstm_reference(x, params, HIDDEN_SIZE, NUM_LAYERS,
                             compute_dtype=jnp.float32)
    assert out_f32.shape == (B, OUTPUT_SIZE)
    assert jnp.allclose(out_f32, ref_f32, atol=1e-5, rtol=1e-5), \
        "Pallas kernel (f32 compute) mismatch vs JAX reference"

    # Default bf16-MXU / f32-accumulate path (perf config), checked against a
    # reference using the same mixed-precision policy, plus a loose sanity
    # check against the pure-f32 reference.
    out_bf16 = lstm_model_forward(x, params, hidden_size=HIDDEN_SIZE,
                                  num_layers=NUM_LAYERS)
    out_bf16 = jax.block_until_ready(out_bf16)
    ref_bf16 = lstm_reference(x, params, HIDDEN_SIZE, NUM_LAYERS,
                              compute_dtype=jnp.bfloat16)
    assert out_bf16.shape == (B, OUTPUT_SIZE)
    assert jnp.allclose(out_bf16, ref_bf16, atol=2e-3, rtol=2e-3), \
        "Pallas kernel (bf16 compute) mismatch vs mixed-precision reference"
    assert jnp.allclose(out_bf16, ref_f32, atol=5e-2, rtol=5e-2), \
        "Pallas kernel (bf16 compute) drifted too far from f32 reference"

    print("KERNEL_OK")
</pallas_src>

<mosaic_0001>
module attributes {stable_mosaic.version = 11 : i64} {
  func.func @kernel(%arg0: i32, %arg1: memref<8x8x16xf32, #tpu.memory_space<vmem>>, %arg2: memref<16x128xf32, #tpu.memory_space<vmem>>, %arg3: memref<32x128xf32, #tpu.memory_space<vmem>>, %arg4: memref<1x128xf32, #tpu.memory_space<vmem>>, %arg5: memref<32x128xf32, #tpu.memory_space<vmem>>, %arg6: memref<32x128xf32, #tpu.memory_space<vmem>>, %arg7: memref<1x128xf32, #tpu.memory_space<vmem>>, %arg8: memref<32x128xf32, #tpu.memory_space<vmem>>, %arg9: memref<1x128xf32, #tpu.memory_space<vmem>>, %arg10: memref<8x128xf32, #tpu.memory_space<vmem>>, %arg11: memref<128x128xf32, #tpu.memory_space<vmem>>, %arg12: memref<64x32xf32, #tpu.memory_space<vmem>>) attributes {dimension_semantics = [#tpu.dimension_semantics<parallel>], iteration_bounds = array<i64: 1>, scalar_prefetch = 0 : i64, scratch_operands = 2 : i64, tpu.core_type = #tpu.core_type<tc>, window_params = [{transform_indices = @transform_0, window_bounds = array<i64: 8, 8, 16>}, {pipeline_mode = #tpu.pipeline_mode<synchronous>, transform_indices = @transform_1, window_bounds = array<i64: 16, 128>}, {pipeline_mode = #tpu.pipeline_mode<synchronous>, transform_indices = @transform_2, window_bounds = array<i64: 32, 128>}, {pipeline_mode = #tpu.pipeline_mode<synchronous>, transform_indices = @transform_3, window_bounds = array<i64: 1, 128>}, {pipeline_mode = #tpu.pipeline_mode<synchronous>, transform_indices = @transform_4, window_bounds = array<i64: 32, 128>}, {pipeline_mode = #tpu.pipeline_mode<synchronous>, transform_indices = @transform_5, window_bounds = array<i64: 32, 128>}, {pipeline_mode = #tpu.pipeline_mode<synchronous>, transform_indices = @transform_6, window_bounds = array<i64: 1, 128>}, {pipeline_mode = #tpu.pipeline_mode<synchronous>, transform_indices = @transform_7, window_bounds = array<i64: 32, 128>}, {pipeline_mode = #tpu.pipeline_mode<synchronous>, transform_indices = @transform_8, window_bounds = array<i64: 1, 128>}, {transform_indices = @transform_9, window_bounds = array<i64: 8, 128>}]} {
    %c0 = arith.constant 0 : index
    %c0_0 = arith.constant 0 : index
    %0 = vector.load %arg2[%c0, %c0_0] : memref<16x128xf32, #tpu.memory_space<vmem>>, vector<16x128xf32>
    %c0_1 = arith.constant 0 : index
    %c0_2 = arith.constant 0 : index
    %1 = vector.load %arg3[%c0_1, %c0_2] : memref<32x128xf32, #tpu.memory_space<vmem>>, vector<32x128xf32>
    %c0_3 = arith.constant 0 : index
    %c0_4 = arith.constant 0 : index
    %2 = vector.load %arg4[%c0_3, %c0_4] : memref<1x128xf32, #tpu.memory_space<vmem>>, vector<1x128xf32>
    %c0_5 = arith.constant 0 : index
    %c0_6 = arith.constant 0 : index
    %c0_7 = arith.constant 0 : index
    %3 = vector.load %arg1[%c0_5, %c0_6, %c0_7] : memref<8x8x16xf32, #tpu.memory_space<vmem>>, vector<8x8x16xf32>
    %4 = vector.shape_cast %3 : vector<8x8x16xf32> to vector<64x16xf32>
    %cst = arith.constant dense<0.000000e+00> : vector<64x128xf32>
    %5 = tpu.matmul %4, %0, %cst {dimension_numbers = #tpu.dot_dimension_numbers<[1], [0], [0], [1], [0, 0, 1, 1], [], []>} : vector<64x16xf32>, vector<16x128xf32>, vector<64x128xf32> -> vector<64x128xf32>
    %6 = vector.broadcast %2 : vector<1x128xf32> to vector<64x128xf32>
    %7 = arith.addf %5, %6 : vector<64x128xf32>
    %c0_8 = arith.constant 0 : index
    %c0_9 = arith.constant 0 : index
    %8 = vector.load %arg11[%c0_8, %c0_9] : memref<128x128xf32, #tpu.memory_space<vmem>>, vector<64x128xf32>
    tpu.vector_store %arg11[%c0_8, %c0_9], %7 {strides = array<i32>} : memref<128x128xf32, #tpu.memory_space<vmem>>, vector<64x128xf32>,
    %cst_10 = arith.constant 0.000000e+00 : f32
    %9 = vector.broadcast %cst_10 : f32 to vector<8x32xf32>
    %cst_11 = arith.constant 0.000000e+00 : f32
    %10 = vector.broadcast %cst_11 : f32 to vector<8x32xf32>
    %c0_i32 = arith.constant 0 : i32
    %c8_i32 = arith.constant 8 : i32
    %11 = arith.muli %c0_i32, %c8_i32 : i32
    %c0_i32_12 = arith.constant 0 : i32
    %12 = arith.addi %c0_i32_12, %11 : i32
    %13 = tpu.assume_multiple %12, 8 : i32
    %14 = arith.index_cast %13 : i32 to index
    %c0_13 = arith.constant 0 : index
    %15 = vector.load %arg11[%14, %c0_13] : memref<128x128xf32, #tpu.memory_space<vmem>>, vector<8x128xf32>
    %cst_14 = arith.constant dense<0.000000e+00> : vector<8x128xf32>
    %16 = tpu.matmul %9, %1, %cst_14 {dimension_numbers = #tpu.dot_dimension_numbers<[1], [0], [0], [1], [0, 0, 1, 1], [], []>} : vector<8x32xf32>, vector<32x128xf32>, vector<8x128xf32> -> vector<8x128xf32>
    %17 = arith.addf %15, %16 : vector<8x128xf32>
    %18 = arith.negf %17 : vector<8x128xf32>
    %19 = math.exp %18 : vector<8x128xf32>
    %cst_15 = arith.constant 1.000000e+00 : f32
    %20 = vector.broadcast %cst_15 : f32 to vector<8x128xf32>
    %21 = arith.addf %20, %19 : vector<8x128xf32>
    %22 = arith.divf %20, %21 : vector<8x128xf32>
    %23 = math.tanh %17 : vector<8x128xf32>
    %24 = vector.extract_strided_slice %23 {offsets = [0, 96], sizes = [8, 32], strides = [1, 1]} : vector<8x128xf32> to vector<8x32xf32>
    %25 = vector.extract_strided_slice %22 {offsets = [0, 0], sizes = [8, 32], strides = [1, 1]} : vector<8x128xf32> to vector<8x32xf32>
    %26 = vector.extract_strided_slice %22 {offsets = [0, 32], sizes = [8, 32], strides = [1, 1]} : vector<8x128xf32> to vector<8x32xf32>
    %27 = vector.extract_strided_slice %22 {offsets = [0, 64], sizes = [8, 32], strides = [1, 1]} : vector<8x128xf32> to vector<8x32xf32>
    %28 = arith.mulf %26, %10 : vector<8x32xf32>
    %29 = arith.mulf %25, %24 : vector<8x32xf32>
    %30 = arith.addf %28, %29 : vector<8x32xf32>
    %31 = math.tanh %30 : vector<8x32xf32>
    %32 = arith.mulf %27, %31 : vector<8x32xf32>
    %c8_i32_16 = arith.constant 8 : i32
    %33 = arith.muli %c0_i32, %c8_i32_16 : i32
    %c0_i32_17 = arith.constant 0 : i32
    %34 = arith.addi %c0_i32_17, %33 : i32
    %35 = tpu.assume_multiple %34, 8 : i32
    %36 = arith.index_cast %35 : i32 to index
    %c0_18 = arith.constant 0 : index
    %37 = vector.load %arg12[%36, %c0_18] : memref<64x32xf32, #tpu.memory_space<vmem>>, vector<8x32xf32>
    tpu.vector_store %arg12[%36, %c0_18], %32 {strides = array<i32>} : memref<64x32xf32, #tpu.memory_space<vmem>>, vector<8x32xf32>,
    %c1_i32 = arith.constant 1 : i32
    %c8_i32_19 = arith.constant 8 : i32
    %38 = arith.muli %c1_i32, %c8_i32_19 : i32
    %c0_i32_20 = arith.constant 0 : i32
    %39 = arith.addi %c0_i32_20, %38 : i32
    %40 = tpu.assume_multiple %39, 8 : i32
    %41 = arith.index_cast %40 : i32 to index
    %c0_21 = arith.constant 0 : index
    %42 = vector.load %arg11[%41, %c0_21] : memref<128x128xf32, #tpu.memory_space<vmem>>, vector<8x128xf32>
    %cst_22 = arith.constant dense<0.000000e+00> : vector<8x128xf32>
    %43 = tpu.matmul %32, %1, %cst_22 {dimension_numbers = #tpu.dot_dimension_numbers<[1], [0], [0], [1], [0, 0, 1, 1], [], []>} : vector<8x32xf32>, vector<32x128xf32>, vector<8x128xf32> -> vector<8x128xf32>
    %44 = arith.addf %42, %43 : vector<8x128xf32>
    %45 = arith.negf %44 : vector<8x128xf32>
    %46 = math.exp %45 : vector<8x128xf32>
    %cst_23 = arith.constant 1.000000e+00 : f32
    %47 = vector.broadcast %cst_23 : f32 to vector<8x128xf32>
    %48 = arith.addf %47, %46 : vector<8x128xf32>
    %49 = arith.divf %47, %48 : vector<8x128xf32>
    %50 = math.tanh %44 : vector<8x128xf32>
    %51 = vector.extract_strided_slice %50 {offsets = [0, 96], sizes = [8, 32], strides = [1, 1]} : vector<8x128xf32> to vector<8x32xf32>
    %52 = vector.extract_strided_slice %49 {offsets = [0, 0], sizes = [8, 32], strides = [1, 1]} : vector<8x128xf32> to vector<8x32xf32>
    %53 = vector.extract_strided_slice %49 {offsets = [0, 32], sizes = [8, 32], strides = [1, 1]} : vector<8x128xf32> to vector<8x32xf32>
    %54 = vector.extract_strided_slice %49 {offsets = [0, 64], sizes = [8, 32], strides = [1, 1]} : vector<8x128xf32> to vector<8x32xf32>
    %55 = arith.mulf %53, %30 : vector<8x32xf32>
    %56 = arith.mulf %52, %51 : vector<8x32xf32>
    %57 = arith.addf %55, %56 : vector<8x32xf32>
    %58 = math.tanh %57 : vector<8x32xf32>
    %59 = arith.mulf %54, %58 : vector<8x32xf32>
    %c8_i32_24 = arith.constant 8 : i32
    %60 = arith.muli %c1_i32, %c8_i32_24 : i32
    %c0_i32_25 = arith.constant 0 : i32
    %61 = arith.addi %c0_i32_25, %60 : i32
    %62 = tpu.assume_multiple %61, 8 : i32
    %63 = arith.index_cast %62 : i32 to index
    %c0_26 = arith.constant 0 : index
    %64 = vector.load %arg12[%63, %c0_26] : memref<64x32xf32, #tpu.memory_space<vmem>>, vector<8x32xf32>
    tpu.vector_store %arg12[%63, %c0_26], %59 {strides = array<i32>} : memref<64x32xf32, #tpu.memory_space<vmem>>, vector<8x32xf32>,
    %c2_i32 = arith.constant 2 : i32
    %c8_i32_27 = arith.constant 8 : i32
    %65 = arith.muli %c2_i32, %c8_i32_27 : i32
    %c0_i32_28 = arith.constant 0 : i32
    %66 = arith.addi %c0_i32_28, %65 : i32
    %67 = tpu.assume_multiple %66, 8 : i32
    %68 = arith.index_cast %67 : i32 to index
    %c0_29 = arith.constant 0 : index
    %69 = vector.load %arg11[%68, %c0_29] : memref<128x128xf32, #tpu.memory_space<vmem>>, vector<8x128xf32>
    %cst_30 = arith.constant dense<0.000000e+00> : vector<8x128xf32>
    %70 = tpu.matmul %59, %1, %cst_30 {dimension_numbers = #tpu.dot_dimension_numbers<[1], [0], [0], [1], [0, 0, 1, 1], [], []>} : vector<8x32xf32>, vector<32x128xf32>, vector<8x128xf32> -> vector<8x128xf32>
    %71 = arith.addf %69, %70 : vector<8x128xf32>
    %72 = arith.negf %71 : vector<8x128xf32>
    %73 = math.exp %72 : vector<8x128xf32>
    %cst_31 = arith.constant 1.000000e+00 : f32
    %74 = vector.broadcast %cst_31 : f32 to vector<8x128xf32>
    %75 = arith.addf %74, %73 : vector<8x128xf32>
    %76 = arith.divf %74, %75 : vector<8x128xf32>
    %77 = math.tanh %71 : vector<8x128xf32>
    %78 = vector.extract_strided_slice %77 {offsets = [0, 96], sizes = [8, 32], strides = [1, 1]} : vector<8x128xf32> to vector<8x32xf32>
    %79 = vector.extract_strided_slice %76 {offsets = [0, 0], sizes = [8, 32], strides = [1, 1]} : vector<8x128xf32> to vector<8x32xf32>
    %80 = vector.extract_strided_slice %76 {offsets = [0, 32], sizes = [8, 32], strides = [1, 1]} : vector<8x128xf32> to vector<8x32xf32>
    %81 = vector.extract_strided_slice %76 {offsets = [0, 64], sizes = [8, 32], strides = [1, 1]} : vector<8x128xf32> to vector<8x32xf32>
    %82 = arith.mulf %80, %57 : vector<8x32xf32>
    %83 = arith.mulf %79, %78 : vector<8x32xf32>
    %84 = arith.addf %82, %83 : vector<8x32xf32>
    %85 = math.tanh %84 : vector<8x32xf32>
    %86 = arith.mulf %81, %85 : vector<8x32xf32>
    %c8_i32_32 = arith.constant 8 : i32
    %87 = arith.muli %c2_i32, %c8_i32_32 : i32
    %c0_i32_33 = arith.constant 0 : i32
    %88 = arith.addi %c0_i32_33, %87 : i32
    %89 = tpu.assume_multiple %88, 8 : i32
    %90 = arith.index_cast %89 : i32 to index
    %c0_34 = arith.constant 0 : index
    %91 = vector.load %arg12[%90, %c0_34] : memref<64x32xf32, #tpu.memory_space<vmem>>, vector<8x32xf32>
    tpu.vector_store %arg12[%90, %c0_34], %86 {strides = array<i32>} : memref<64x32xf32, #tpu.memory_space<vmem>>, vector<8x32xf32>,
    %c3_i32 = arith.constant 3 : i32
    %c8_i32_35 = arith.constant 8 : i32
    %92 = arith.muli %c3_i32, %c8_i32_35 : i32
    %c0_i32_36 = arith.constant 0 : i32
    %93 = arith.addi %c0_i32_36, %92 : i32
    %94 = tpu.assume_multiple %93, 8 : i32
    %95 = arith.index_cast %94 : i32 to index
    %c0_37 = arith.constant 0 : index
    %96 = vector.load %arg11[%95, %c0_37] : memref<128x128xf32, #tpu.memory_space<vmem>>, vector<8x128xf32>
    %cst_38 = arith.constant dense<0.000000e+00> : vector<8x128xf32>
    %97 = tpu.matmul %86, %1, %cst_38 {dimension_numbers = #tpu.dot_dimension_numbers<[1], [0], [0], [1], [0, 0, 1, 1], [], []>} : vector<8x32xf32>, vector<32x128xf32>, vector<8x128xf32> -> vector<8x128xf32>
    %98 = arith.addf %96, %97 : vector<8x128xf32>
    %99 = arith.negf %98 : vector<8x128xf32>
    %100 = math.exp %99 : vector<8x128xf32>
    %cst_39 = arith.constant 1.000000e+00 : f32
    %101 = vector.broadcast %cst_39 : f32 to vector<8x128xf32>
    %102 = arith.addf %101, %100 : vector<8x128xf32>
    %103 = arith.divf %101, %102 : vector<8x128xf32>
    %104 = math.tanh %98 : vector<8x128xf32>
    %105 = vector.extract_strided_slice %104 {offsets = [0, 96], sizes = [8, 32], strides = [1, 1]} : vector<8x128xf32> to vector<8x32xf32>
    %106 = vector.extract_strided_slice %103 {offsets = [0, 0], sizes = [8, 32], strides = [1, 1]} : vector<8x128xf32> to vector<8x32xf32>
    %107 = vector.extract_strided_slice %103 {offsets = [0, 32], sizes = [8, 32], strides = [1, 1]} : vector<8x128xf32> to vector<8x32xf32>
    %108 = vector.extract_strided_slice %103 {offsets = [0, 64], sizes = [8, 32], strides = [1, 1]} : vector<8x128xf32> to vector<8x32xf32>
    %109 = arith.mulf %107, %84 : vector<8x32xf32>
    %110 = arith.mulf %106, %105 : vector<8x32xf32>
    %111 = arith.addf %109, %110 : vector<8x32xf32>
    %112 = math.tanh %111 : vector<8x32xf32>
    %113 = arith.mulf %108, %112 : vector<8x32xf32>
    %c8_i32_40 = arith.constant 8 : i32
    %114 = arith.muli %c3_i32, %c8_i32_40 : i32
    %c0_i32_41 = arith.constant 0 : i32
    %115 = arith.addi %c0_i32_41, %114 : i32
    %116 = tpu.assume_multiple %115, 8 : i32
    %117 = arith.index_cast %116 : i32 to index
    %c0_42 = arith.constant 0 : index
    %118 = vector.load %arg12[%117, %c0_42] : memref<64x32xf32, #tpu.memory_space<vmem>>, vector<8x32xf32>
    tpu.vector_store %arg12[%117, %c0_42], %113 {strides = array<i32>} : memref<64x32xf32, #tpu.memory_space<vmem>>, vector<8x32xf32>,
    %c4_i32 = arith.constant 4 : i32
    %c8_i32_43 = arith.constant 8 : i32
    %119 = arith.muli %c4_i32, %c8_i32_43 : i32
    %c0_i32_44 = arith.constant 0 : i32
    %120 = arith.addi %c0_i32_44, %119 : i32
    %121 = tpu.assume_multiple %120, 8 : i32
    %122 = arith.index_cast %121 : i32 to index
    %c0_45 = arith.constant 0 : index
    %123 = vector.load %arg11[%122, %c0_45] : memref<128x128xf32, #tpu.memory_space<vmem>>, vector<8x128xf32>
    %cst_46 = arith.constant dense<0.000000e+00> : vector<8x128xf32>
    %124 = tpu.matmul %113, %1, %cst_46 {dimension_numbers = #tpu.dot_dimension_numbers<[1], [0], [0], [1], [0, 0, 1, 1], [], []>} : vector<8x32xf32>, vector<32x128xf32>, vector<8x128xf32> -> vector<8x128xf32>
    %125 = arith.addf %123, %124 : vector<8x128xf32>
    %126 = arith.negf %125 : vector<8x128xf32>
    %127 = math.exp %126 : vector<8x128xf32>
    %cst_47 = arith.constant 1.000000e+00 : f32
    %128 = vector.broadcast %cst_47 : f32 to vector<8x128xf32>
    %129 = arith.addf %128, %127 : vector<8x128xf32>
    %130 = arith.divf %128, %129 : vector<8x128xf32>
    %131 = math.tanh %125 : vector<8x128xf32>
    %132 = vector.extract_strided_slice %131 {offsets = [0, 96], sizes = [8, 32], strides = [1, 1]} : vector<8x128xf32> to vector<8x32xf32>
    %133 = vector.extract_strided_slice %130 {offsets = [0, 0], sizes = [8, 32], strides = [1, 1]} : vector<8x128xf32> to vector<8x32xf32>
    %134 = vector.extract_strided_slice %130 {offsets = [0, 32], sizes = [8, 32], strides = [1, 1]} : vector<8x128xf32> to vector<8x32xf32>
    %135 = vector.extract_strided_slice %130 {offsets = [0, 64], sizes = [8, 32], strides = [1, 1]} : vector<8x128xf32> to vector<8x32xf32>
    %136 = arith.mulf %134, %111 : vector<8x32xf32>
    %137 = arith.mulf %133, %132 : vector<8x32xf32>
    %138 = arith.addf %136, %137 : vector<8x32xf32>
    %139 = math.tanh %138 : vector<8x32xf32>
    %140 = arith.mulf %135, %139 : vector<8x32xf32>
    %c8_i32_48 = arith.constant 8 : i32
    %141 = arith.muli %c4_i32, %c8_i32_48 : i32
    %c0_i32_49 = arith.constant 0 : i32
    %142 = arith.addi %c0_i32_49, %141 : i32
    %143 = tpu.assume_multiple %142, 8 : i32
    %144 = arith.index_cast %143 : i32 to index
    %c0_50 = arith.constant 0 : index
    %145 = vector.load %arg12[%144, %c0_50] : memref<64x32xf32, #tpu.memory_space<vmem>>, vector<8x32xf32>
    tpu.vector_store %arg12[%144, %c0_50], %140 {strides = array<i32>} : memref<64x32xf32, #tpu.memory_space<vmem>>, vector<8x32xf32>,
    %c5_i32 = arith.constant 5 : i32
    %c8_i32_51 = arith.constant 8 : i32
    %146 = arith.muli %c5_i32, %c8_i32_51 : i32
    %c0_i32_52 = arith.constant 0 : i32
    %147 = arith.addi %c0_i32_52, %146 : i32
    %148 = tpu.assume_multiple %147, 8 : i32
    %149 = arith.index_cast %148 : i32 to index
    %c0_53 = arith.constant 0 : index
    %150 = vector.load %arg11[%149, %c0_53] : memref<128x128xf32, #tpu.memory_space<vmem>>, vector<8x128xf32>
    %cst_54 = arith.constant dense<0.000000e+00> : vector<8x128xf32>
    %151 = tpu.matmul %140, %1, %cst_54 {dimension_numbers = #tpu.dot_dimension_numbers<[1], [0], [0], [1], [0, 0, 1, 1], [], []>} : vector<8x32xf32>, vector<32x128xf32>, vector<8x128xf32> -> vector<8x128xf32>
    %152 = arith.addf %150, %151 : vector<8x128xf32>
    %153 = arith.negf %152 : vector<8x128xf32>
    %154 = math.exp %153 : vector<8x128xf32>
    %cst_55 = arith.constant 1.000000e+00 : f32
    %155 = vector.broadcast %cst_55 : f32 to vector<8x128xf32>
    %156 = arith.addf %155, %154 : vector<8x128xf32>
    %157 = arith.divf %155, %156 : vector<8x128xf32>
    %158 = math.tanh %152 : vector<8x128xf32>
    %159 = vector.extract_strided_slice %158 {offsets = [0, 96], sizes = [8, 32], strides = [1, 1]} : vector<8x128xf32> to vector<8x32xf32>
    %160 = vector.extract_strided_slice %157 {offsets = [0, 0], sizes = [8, 32], strides = [1, 1]} : vector<8x128xf32> to vector<8x32xf32>
    %161 = vector.extract_strided_slice %157 {offsets = [0, 32], sizes = [8, 32], strides = [1, 1]} : vector<8x128xf32> to vector<8x32xf32>
    %162 = vector.extract_strided_slice %157 {offsets = [0, 64], sizes = [8, 32], strides = [1, 1]} : vector<8x128xf32> to vector<8x32xf32>
    %163 = arith.mulf %161, %138 : vector<8x32xf32>
    %164 = arith.mulf %160, %159 : vector<8x32xf32>
    %165 = arith.addf %163, %164 : vector<8x32xf32>
    %166 = math.tanh %165 : vector<8x32xf32>
    %167 = arith.mulf %162, %166 : vector<8x32xf32>
    %c8_i32_56 = arith.constant 8 : i32
    %168 = arith.muli %c5_i32, %c8_i32_56 : i32
    %c0_i32_57 = arith.constant 0 : i32
    %169 = arith.addi %c0_i32_57, %168 : i32
    %170 = tpu.assume_multiple %169, 8 : i32
    %171 = arith.index_cast %170 : i32 to index
    %c0_58 = arith.constant 0 : index
    %172 = vector.load %arg12[%171, %c0_58] : memref<64x32xf32, #tpu.memory_space<vmem>>, vector<8x32xf32>
    tpu.vector_store %arg12[%171, %c0_58], %167 {strides = array<i32>} : memref<64x32xf32, #tpu.memory_space<vmem>>, vector<8x32xf32>,
    %c6_i32 = arith.constant 6 : i32
    %c8_i32_59 = arith.constant 8 : i32
    %173 = arith.muli %c6_i32, %c8_i32_59 : i32
    %c0_i32_60 = arith.constant 0 : i32
    %174 = arith.addi %c0_i32_60, %173 : i32
    %175 = tpu.assume_multiple %174, 8 : i32
    %176 = arith.index_cast %175 : i32 to index
    %c0_61 = arith.constant 0 : index
    %177 = vector.load %arg11[%176, %c0_61] : memref<128x128xf32, #tpu.memory_space<vmem>>, vector<8x128xf32>
    %cst_62 = arith.constant dense<0.000000e+00> : vector<8x128xf32>
    %178 = tpu.matmul %167, %1, %cst_62 {dimension_numbers = #tpu.dot_dimension_numbers<[1], [0], [0], [1], [0, 0, 1, 1], [], []>} : vector<8x32xf32>, vector<32x128xf32>, vector<8x128xf32> -> vector<8x128xf32>
    %179 = arith.addf %177, %178 : vector<8x128xf32>
    %180 = arith.negf %179 : vector<8x128xf32>
    %181 = math.exp %180 : vector<8x128xf32>
    %cst_63 = arith.constant 1.000000e+00 : f32
    %182 = vector.broadcast %cst_63 : f32 to vector<8x128xf32>
    %183 = arith.addf %182, %181 : vector<8x128xf32>
    %184 = arith.divf %182, %183 : vector<8x128xf32>
    %185 = math.tanh %179 : vector<8x128xf32>
    %186 = vector.extract_strided_slice %185 {offsets = [0, 96], sizes = [8, 32], strides = [1, 1]} : vector<8x128xf32> to vector<8x32xf32>
    %187 = vector.extract_strided_slice %184 {offsets = [0, 0], sizes = [8, 32], strides = [1, 1]} : vector<8x128xf32> to vector<8x32xf32>
    %188 = vector.extract_strided_slice %184 {offsets = [0, 32], sizes = [8, 32], strides = [1, 1]} : vector<8x128xf32> to vector<8x32xf32>
    %189 = vector.extract_strided_slice %184 {offsets = [0, 64], sizes = [8, 32], strides = [1, 1]} : vector<8x128xf32> to vector<8x32xf32>
    %190 = arith.mulf %188, %165 : vector<8x32xf32>
    %191 = arith.mulf %187, %186 : vector<8x32xf32>
    %192 = arith.addf %190, %191 : vector<8x32xf32>
    %193 = math.tanh %192 : vector<8x32xf32>
    %194 = arith.mulf %189, %193 : vector<8x32xf32>
    %c8_i32_64 = arith.constant 8 : i32
    %195 = arith.muli %c6_i32, %c8_i32_64 : i32
    %c0_i32_65 = arith.constant 0 : i32
    %196 = arith.addi %c0_i32_65, %195 : i32
    %197 = tpu.assume_multiple %196, 8 : i32
    %198 = arith.index_cast %197 : i32 to index
    %c0_66 = arith.constant 0 : index
    %199 = vector.load %arg12[%198, %c0_66] : memref<64x32xf32, #tpu.memory_space<vmem>>, vector<8x32xf32>
    tpu.vector_store %arg12[%198, %c0_66], %194 {strides = array<i32>} : memref<64x32xf32, #tpu.memory_space<vmem>>, vector<8x32xf32>,
    %c7_i32 = arith.constant 7 : i32
    %c8_i32_67 = arith.constant 8 : i32
    %200 = arith.muli %c7_i32, %c8_i32_67 : i32
    %c0_i32_68 = arith.constant 0 : i32
    %201 = arith.addi %c0_i32_68, %200 : i32
    %202 = tpu.assume_multiple %201, 8 : i32
    %203 = arith.index_cast %202 : i32 to index
    %c0_69 = arith.constant 0 : index
    %204 = vector.load %arg11[%203, %c0_69] : memref<128x128xf32, #tpu.memory_space<vmem>>, vector<8x128xf32>
    %cst_70 = arith.constant dense<0.000000e+00> : vector<8x128xf32>
    %205 = tpu.matmul %194, %1, %cst_70 {dimension_numbers = #tpu.dot_dimension_numbers<[1], [0], [0], [1], [0, 0, 1, 1], [], []>} : vector<8x32xf32>, vector<32x128xf32>, vector<8x128xf32> -> vector<8x128xf32>
    %206 = arith.addf %204, %205 : vector<8x128xf32>
    %207 = arith.negf %206 : vector<8x128xf32>
    %208 = math.exp %207 : vector<8x128xf32>
    %cst_71 = arith.constant 1.000000e+00 : f32
    %209 = vector.broadcast %cst_71 : f32 to vector<8x128xf32>
    %210 = arith.addf %209, %208 : vector<8x128xf32>
    %211 = arith.divf %209, %210 : vector<8x128xf32>
    %212 = math.tanh %206 : vector<8x128xf32>
    %213 = vector.extract_strided_slice %212 {offsets = [0, 96], sizes = [8, 32], strides = [1, 1]} : vector<8x128xf32> to vector<8x32xf32>
    %214 = vector.extract_strided_slice %211 {offsets = [0, 0], sizes = [8, 32], strides = [1, 1]} : vector<8x128xf32> to vector<8x32xf32>
    %215 = vector.extract_strided_slice %211 {offsets = [0, 32], sizes = [8, 32], strides = [1, 1]} : vector<8x128xf32> to vector<8x32xf32>
    %216 = vector.extract_strided_slice %211 {offsets = [0, 64], sizes = [8, 32], strides = [1, 1]} : vector<8x128xf32> to vector<8x32xf32>
    %217 = arith.mulf %215, %192 : vector<8x32xf32>
    %218 = arith.mulf %214, %213 : vector<8x32xf32>
    %219 = arith.addf %217, %218 : vector<8x32xf32>
    %220 = math.tanh %219 : vector<8x32xf32>
    %221 = arith.mulf %216, %220 : vector<8x32xf32>
    %c8_i32_72 = arith.constant 8 : i32
    %222 = arith.muli %c7_i32, %c8_i32_72 : i32
    %c0_i32_73 = arith.constant 0 : i32
    %223 = arith.addi %c0_i32_73, %222 : i32
    %224 = tpu.assume_multiple %223, 8 : i32
    %225 = arith.index_cast %224 : i32 to index
    %c0_74 = arith.constant 0 : index
    %226 = vector.load %arg12[%225, %c0_74] : memref<64x32xf32, #tpu.memory_space<vmem>>, vector<8x32xf32>
    tpu.vector_store %arg12[%225, %c0_74], %221 {strides = array<i32>} : memref<64x32xf32, #tpu.memory_space<vmem>>, vector<8x32xf32>,
    %c8_i32_75 = arith.constant 8 : i32
    %c0_76 = arith.constant 0 : index
    %c0_77 = arith.constant 0 : index
    %227 = vector.load %arg5[%c0_76, %c0_77] : memref<32x128xf32, #tpu.memory_space<vmem>>, vector<32x128xf32>
    %c0_78 = arith.constant 0 : index
    %c0_79 = arith.constant 0 : index
    %228 = vector.load %arg6[%c0_78, %c0_79] : memref<32x128xf32, #tpu.memory_space<vmem>>, vector<32x128xf32>
    %c0_80 = arith.constant 0 : index
    %c0_81 = arith.constant 0 : index
    %229 = vector.load %arg7[%c0_80, %c0_81] : memref<1x128xf32, #tpu.memory_space<vmem>>, vector<1x128xf32>
    %c0_82 = arith.constant 0 : index
    %c0_83 = arith.constant 0 : index
    %230 = vector.load %arg12[%c0_82, %c0_83] : memref<64x32xf32, #tpu.memory_space<vmem>>, vector<64x32xf32>
    %cst_84 = arith.constant dense<0.000000e+00> : vector<64x128xf32>
    %231 = tpu.matmul %230, %227, %cst_84 {dimension_numbers = #tpu.dot_dimension_numbers<[1], [0], [0], [1], [0, 0, 1, 1], [], []>} : vector<64x32xf32>, vector<32x128xf32>, vector<64x128xf32> -> vector<64x128xf32>
    %232 = vector.broadcast %229 : vector<1x128xf32> to vector<64x128xf32>
    %233 = arith.addf %231, %232 : vector<64x128xf32>
    %c0_85 = arith.constant 0 : index
    %c0_86 = arith.constant 0 : index
    %234 = vector.load %arg11[%c0_85, %c0_86] : memref<128x128xf32, #tpu.memory_space<vmem>>, vector<64x128xf32>
    tpu.vector_store %arg11[%c0_85, %c0_86], %233 {strides = array<i32>} : memref<128x128xf32, #tpu.memory_space<vmem>>, vector<64x128xf32>,
    %cst_87 = arith.constant 0.000000e+00 : f32
    %235 = vector.broadcast %cst_87 : f32 to vector<8x32xf32>
    %cst_88 = arith.constant 0.000000e+00 : f32
    %236 = vector.broadcast %cst_88 : f32 to vector<8x32xf32>
    %c0_i32_89 = arith.constant 0 : i32
    %c8_i32_90 = arith.constant 8 : i32
    %237 = arith.muli %c0_i32_89, %c8_i32_90 : i32
    %c0_i32_91 = arith.constant 0 : i32
    %238 = arith.addi %c0_i32_91, %237 : i32
    %239 = tpu.assume_multiple %238, 8 : i32
    %240 = arith.index_cast %239 : i32 to index
    %c0_92 = arith.constant 0 : index
    %241 = vector.load %arg11[%240, %c0_92] : memref<128x128xf32, #tpu.memory_space<vmem>>, vector<8x128xf32>
    %cst_93 = arith.constant dense<0.000000e+00> : vector<8x128xf32>
    %242 = tpu.matmul %235, %228, %cst_93 {dimension_numbers = #tpu.dot_dimension_numbers<[1], [0], [0], [1], [0, 0, 1, 1], [], []>} : vector<8x32xf32>, vector<32x128xf32>, vector<8x128xf32> -> vector<8x128xf32>
    %243 = arith.addf %241, %242 : vector<8x128xf32>
    %244 = arith.negf %243 : vector<8x128xf32>
    %245 = math.exp %244 : vector<8x128xf32>
    %cst_94 = arith.constant 1.000000e+00 : f32
    %246 = vector.broadcast %cst_94 : f32 to vector<8x128xf32>
    %247 = arith.addf %246, %245 : vector<8x128xf32>
    %248 = arith.divf %246, %247 : vector<8x128xf32>
    %249 = math.tanh %243 : vector<8x128xf32>
    %250 = vector.extract_strided_slice %249 {offsets = [0, 96], sizes = [8, 32], strides = [1, 1]} : vector<8x128xf32> to vector<8x32xf32>
    %251 = vector.extract_strided_slice %248 {offsets = [0, 0], sizes = [8, 32], strides = [1, 1]} : vector<8x128xf32> to vector<8x32xf32>
    %252 = vector.extract_strided_slice %248 {offsets = [0, 32], sizes = [8, 32], strides = [1, 1]} : vector<8x128xf32> to vector<8x32xf32>
    %253 = vector.extract_strided_slice %248 {offsets = [0, 64], sizes = [8, 32], strides = [1, 1]} : vector<8x128xf32> to vector<8x32xf32>
    %254 = arith.mulf %252, %236 : vector<8x32xf32>
    %255 = arith.mulf %251, %250 : vector<8x32xf32>
    %256 = arith.addf %254, %255 : vector<8x32xf32>
    %257 = math.tanh %256 : vector<8x32xf32>
    %258 = arith.mulf %253, %257 : vector<8x32xf32>
    %c1_i32_95 = arith.constant 1 : i32
    %c8_i32_96 = arith.constant 8 : i32
    %259 = arith.muli %c1_i32_95, %c8_i32_96 : i32
    %c0_i32_97 = arith.constant 0 : i32
    %260 = arith.addi %c0_i32_97, %259 : i32
    %261 = tpu.assume_multiple %260, 8 : i32
    %262 = arith.index_cast %261 : i32 to index
    %c0_98 = arith.constant 0 : index
    %263 = vector.load %arg11[%262, %c0_98] : memref<128x128xf32, #tpu.memory_space<vmem>>, vector<8x128xf32>
    %cst_99 = arith.constant dense<0.000000e+00> : vector<8x128xf32>
    %264 = tpu.matmul %258, %228, %cst_99 {dimension_numbers = #tpu.dot_dimension_numbers<[1], [0], [0], [1], [0, 0, 1, 1], [], []>} : vector<8x32xf32>, vector<32x128xf32>, vector<8x128xf32> -> vector<8x128xf32>
    %265 = arith.addf %263, %264 : vector<8x128xf32>
    %266 = arith.negf %265 : vector<8x128xf32>
    %267 = math.exp %266 : vector<8x128xf32>
    %cst_100 = arith.constant 1.000000e+00 : f32
    %268 = vector.broadcast %cst_100 : f32 to vector<8x128xf32>
    %269 = arith.addf %268, %267 : vector<8x128xf32>
    %270 = arith.divf %268, %269 : vector<8x128xf32>
    %271 = math.tanh %265 : vector<8x128xf32>
    %272 = vector.extract_strided_slice %271 {offsets = [0, 96], sizes = [8, 32], strides = [1, 1]} : vector<8x128xf32> to vector<8x32xf32>
    %273 = vector.extract_strided_slice %270 {offsets = [0, 0], sizes = [8, 32], strides = [1, 1]} : vector<8x128xf32> to vector<8x32xf32>
    %274 = vector.extract_strided_slice %270 {offsets = [0, 32], sizes = [8, 32], strides = [1, 1]} : vector<8x128xf32> to vector<8x32xf32>
    %275 = vector.extract_strided_slice %270 {offsets = [0, 64], sizes = [8, 32], strides = [1, 1]} : vector<8x128xf32> to vector<8x32xf32>
    %276 = arith.mulf %274, %256 : vector<8x32xf32>
    %277 = arith.mulf %273, %272 : vector<8x32xf32>
    %278 = arith.addf %276, %277 : vector<8x32xf32>
    %279 = math.tanh %278 : vector<8x32xf32>
    %280 = arith.mulf %275, %279 : vector<8x32xf32>
    %c2_i32_101 = arith.constant 2 : i32
    %c8_i32_102 = arith.constant 8 : i32
    %281 = arith.muli %c2_i32_101, %c8_i32_102 : i32
    %c0_i32_103 = arith.constant 0 : i32
    %282 = arith.addi %c0_i32_103, %281 : i32
    %283 = tpu.assume_multiple %282, 8 : i32
    %284 = arith.index_cast %283 : i32 to index
    %c0_104 = arith.constant 0 : index
    %285 = vector.load %arg11[%284, %c0_104] : memref<128x128xf32, #tpu.memory_space<vmem>>, vector<8x128xf32>
    %cst_105 = arith.constant dense<0.000000e+00> : vector<8x128xf32>
    %286 = tpu.matmul %280, %228, %cst_105 {dimension_numbers = #tpu.dot_dimension_numbers<[1], [0], [0], [1], [0, 0, 1, 1], [], []>} : vector<8x32xf32>, vector<32x128xf32>, vector<8x128xf32> -> vector<8x128xf32>
    %287 = arith.addf %285, %286 : vector<8x128xf32>
    %288 = arith.negf %287 : vector<8x128xf32>
    %289 = math.exp %288 : vector<8x128xf32>
    %cst_106 = arith.constant 1.000000e+00 : f32
    %290 = vector.broadcast %cst_106 : f32 to vector<8x128xf32>
    %291 = arith.addf %290, %289 : vector<8x128xf32>
    %292 = arith.divf %290, %291 : vector<8x128xf32>
    %293 = math.tanh %287 : vector<8x128xf32>
    %294 = vector.extract_strided_slice %293 {offsets = [0, 96], sizes = [8, 32], strides = [1, 1]} : vector<8x128xf32> to vector<8x32xf32>
    %295 = vector.extract_strided_slice %292 {offsets = [0, 0], sizes = [8, 32], strides = [1, 1]} : vector<8x128xf32> to vector<8x32xf32>
    %296 = vector.extract_strided_slice %292 {offsets = [0, 32], sizes = [8, 32], strides = [1, 1]} : vector<8x128xf32> to vector<8x32xf32>
    %297 = vector.extract_strided_slice %292 {offsets = [0, 64], sizes = [8, 32], strides = [1, 1]} : vector<8x128xf32> to vector<8x32xf32>
    %298 = arith.mulf %296, %278 : vector<8x32xf32>
    %299 = arith.mulf %295, %294 : vector<8x32xf32>
    %300 = arith.addf %298, %299 : vector<8x32xf32>
    %301 = math.tanh %300 : vector<8x32xf32>
    %302 = arith.mulf %297, %301 : vector<8x32xf32>
    %c3_i32_107 = arith.constant 3 : i32
    %c8_i32_108 = arith.constant 8 : i32
    %303 = arith.muli %c3_i32_107, %c8_i32_108 : i32
    %c0_i32_109 = arith.constant 0 : i32
    %304 = arith.addi %c0_i32_109, %303 : i32
    %305 = tpu.assume_multiple %304, 8 : i32
    %306 = arith.index_cast %305 : i32 to index
    %c0_110 = arith.constant 0 : index
    %307 = vector.load %arg11[%306, %c0_110] : memref<128x128xf32, #tpu.memory_space<vmem>>, vector<8x128xf32>
    %cst_111 = arith.constant dense<0.000000e+00> : vector<8x128xf32>
    %308 = tpu.matmul %302, %228, %cst_111 {dimension_numbers = #tpu.dot_dimension_numbers<[1], [0], [0], [1], [0, 0, 1, 1], [], []>} : vector<8x32xf32>, vector<32x128xf32>, vector<8x128xf32> -> vector<8x128xf32>
    %309 = arith.addf %307, %308 : vector<8x128xf32>
    %310 = arith.negf %309 : vector<8x128xf32>
    %311 = math.exp %310 : vector<8x128xf32>
    %cst_112 = arith.constant 1.000000e+00 : f32
    %312 = vector.broadcast %cst_112 : f32 to vector<8x128xf32>
    %313 = arith.addf %312, %311 : vector<8x128xf32>
    %314 = arith.divf %312, %313 : vector<8x128xf32>
    %315 = math.tanh %309 : vector<8x128xf32>
    %316 = vector.extract_strided_slice %315 {offsets = [0, 96], sizes = [8, 32], strides = [1, 1]} : vector<8x128xf32> to vector<8x32xf32>
    %317 = vector.extract_strided_slice %314 {offsets = [0, 0], sizes = [8, 32], strides = [1, 1]} : vector<8x128xf32> to vector<8x32xf32>
    %318 = vector.extract_strided_slice %314 {offsets = [0, 32], sizes = [8, 32], strides = [1, 1]} : vector<8x128xf32> to vector<8x32xf32>
    %319 = vector.extract_strided_slice %314 {offsets = [0, 64], sizes = [8, 32], strides = [1, 1]} : vector<8x128xf32> to vector<8x32xf32>
    %320 = arith.mulf %318, %300 : vector<8x32xf32>
    %321 = arith.mulf %317, %316 : vector<8x32xf32>
    %322 = arith.addf %320, %321 : vector<8x32xf32>
    %323 = math.tanh %322 : vector<8x32xf32>
    %324 = arith.mulf %319, %323 : vector<8x32xf32>
    %c4_i32_113 = arith.constant 4 : i32
    %c8_i32_114 = arith.constant 8 : i32
    %325 = arith.muli %c4_i32_113, %c8_i32_114 : i32
    %c0_i32_115 = arith.constant 0 : i32
    %326 = arith.addi %c0_i32_115, %325 : i32
    %327 = tpu.assume_multiple %326, 8 : i32
    %328 = arith.index_cast %327 : i32 to index
    %c0_116 = arith.constant 0 : index
    %329 = vector.load %arg11[%328, %c0_116] : memref<128x128xf32, #tpu.memory_space<vmem>>, vector<8x128xf32>
    %cst_117 = arith.constant dense<0.000000e+00> : vector<8x128xf32>
    %330 = tpu.matmul %324, %228, %cst_117 {dimension_numbers = #tpu.dot_dimension_numbers<[1], [0], [0], [1], [0, 0, 1, 1], [], []>} : vector<8x32xf32>, vector<32x128xf32>, vector<8x128xf32> -> vector<8x128xf32>
    %331 = arith.addf %329, %330 : vector<8x128xf32>
    %332 = arith.negf %331 : vector<8x128xf32>
    %333 = math.exp %332 : vector<8x128xf32>
    %cst_118 = arith.constant 1.000000e+00 : f32
    %334 = vector.broadcast %cst_118 : f32 to vector<8x128xf32>
    %335 = arith.addf %334, %333 : vector<8x128xf32>
    %336 = arith.divf %334, %335 : vector<8x128xf32>
    %337 = math.tanh %331 : vector<8x128xf32>
    %338 = vector.extract_strided_slice %337 {offsets = [0, 96], sizes = [8, 32], strides = [1, 1]} : vector<8x128xf32> to vector<8x32xf32>
    %339 = vector.extract_strided_slice %336 {offsets = [0, 0], sizes = [8, 32], strides = [1, 1]} : vector<8x128xf32> to vector<8x32xf32>
    %340 = vector.extract_strided_slice %336 {offsets = [0, 32], sizes = [8, 32], strides = [1, 1]} : vector<8x128xf32> to vector<8x32xf32>
    %341 = vector.extract_strided_slice %336 {offsets = [0, 64], sizes = [8, 32], strides = [1, 1]} : vector<8x128xf32> to vector<8x32xf32>
    %342 = arith.mulf %340, %322 : vector<8x32xf32>
    %343 = arith.mulf %339, %338 : vector<8x32xf32>
    %344 = arith.addf %342, %343 : vector<8x32xf32>
    %345 = math.tanh %344 : vector<8x32xf32>
    %346 = arith.mulf %341, %345 : vector<8x32xf32>
    %c5_i32_119 = arith.constant 5 : i32
    %c8_i32_120 = arith.constant 8 : i32
    %347 = arith.muli %c5_i32_119, %c8_i32_120 : i32
    %c0_i32_121 = arith.constant 0 : i32
    %348 = arith.addi %c0_i32_121, %347 : i32
    %349 = tpu.assume_multiple %348, 8 : i32
    %350 = arith.index_cast %349 : i32 to index
    %c0_122 = arith.constant 0 : index
    %351 = vector.load %arg11[%350, %c0_122] : memref<128x128xf32, #tpu.memory_space<vmem>>, vector<8x128xf32>
    %cst_123 = arith.constant dense<0.000000e+00> : vector<8x128xf32>
    %352 = tpu.matmul %346, %228, %cst_123 {dimension_numbers = #tpu.dot_dimension_numbers<[1], [0], [0], [1], [0, 0, 1, 1], [], []>} : vector<8x32xf32>, vector<32x128xf32>, vector<8x128xf32> -> vector<8x128xf32>
    %353 = arith.addf %351, %352 : vector<8x128xf32>
    %354 = arith.negf %353 : vector<8x128xf32>
    %355 = math.exp %354 : vector<8x128xf32>
    %cst_124 = arith.constant 1.000000e+00 : f32
    %356 = vector.broadcast %cst_124 : f32 to vector<8x128xf32>
    %357 = arith.addf %356, %355 : vector<8x128xf32>
    %358 = arith.divf %356, %357 : vector<8x128xf32>
    %359 = math.tanh %353 : vector<8x128xf32>
    %360 = vector.extract_strided_slice %359 {offsets = [0, 96], sizes = [8, 32], strides = [1, 1]} : vector<8x128xf32> to vector<8x32xf32>
    %361 = vector.extract_strided_slice %358 {offsets = [0, 0], sizes = [8, 32], strides = [1, 1]} : vector<8x128xf32> to vector<8x32xf32>
    %362 = vector.extract_strided_slice %358 {offsets = [0, 32], sizes = [8, 32], strides = [1, 1]} : vector<8x128xf32> to vector<8x32xf32>
    %363 = vector.extract_strided_slice %358 {offsets = [0, 64], sizes = [8, 32], strides = [1, 1]} : vector<8x128xf32> to vector<8x32xf32>
    %364 = arith.mulf %362, %344 : vector<8x32xf32>
    %365 = arith.mulf %361, %360 : vector<8x32xf32>
    %366 = arith.addf %364, %365 : vector<8x32xf32>
    %367 = math.tanh %366 : vector<8x32xf32>
    %368 = arith.mulf %363, %367 : vector<8x32xf32>
    %c6_i32_125 = arith.constant 6 : i32
    %c8_i32_126 = arith.constant 8 : i32
    %369 = arith.muli %c6_i32_125, %c8_i32_126 : i32
    %c0_i32_127 = arith.constant 0 : i32
    %370 = arith.addi %c0_i32_127, %369 : i32
    %371 = tpu.assume_multiple %370, 8 : i32
    %372 = arith.index_cast %371 : i32 to index
    %c0_128 = arith.constant 0 : index
    %373 = vector.load %arg11[%372, %c0_128] : memref<128x128xf32, #tpu.memory_space<vmem>>, vector<8x128xf32>
    %cst_129 = arith.constant dense<0.000000e+00> : vector<8x128xf32>
    %374 = tpu.matmul %368, %228, %cst_129 {dimension_numbers = #tpu.dot_dimension_numbers<[1], [0], [0], [1], [0, 0, 1, 1], [], []>} : vector<8x32xf32>, vector<32x128xf32>, vector<8x128xf32> -> vector<8x128xf32>
    %375 = arith.addf %373, %374 : vector<8x128xf32>
    %376 = arith.negf %375 : vector<8x128xf32>
    %377 = math.exp %376 : vector<8x128xf32>
    %cst_130 = arith.constant 1.000000e+00 : f32
    %378 = vector.broadcast %cst_130 : f32 to vector<8x128xf32>
    %379 = arith.addf %378, %377 : vector<8x128xf32>
    %380 = arith.divf %378, %379 : vector<8x128xf32>
    %381 = math.tanh %375 : vector<8x128xf32>
    %382 = vector.extract_strided_slice %381 {offsets = [0, 96], sizes = [8, 32], strides = [1, 1]} : vector<8x128xf32> to vector<8x32xf32>
    %383 = vector.extract_strided_slice %380 {offsets = [0, 0], sizes = [8, 32], strides = [1, 1]} : vector<8x128xf32> to vector<8x32xf32>
    %384 = vector.extract_strided_slice %380 {offsets = [0, 32], sizes = [8, 32], strides = [1, 1]} : vector<8x128xf32> to vector<8x32xf32>
    %385 = vector.extract_strided_slice %380 {offsets = [0, 64], sizes = [8, 32], strides = [1, 1]} : vector<8x128xf32> to vector<8x32xf32>
    %386 = arith.mulf %384, %366 : vector<8x32xf32>
    %387 = arith.mulf %383, %382 : vector<8x32xf32>
    %388 = arith.addf %386, %387 : vector<8x32xf32>
    %389 = math.tanh %388 : vector<8x32xf32>
    %390 = arith.mulf %385, %389 : vector<8x32xf32>
    %c7_i32_131 = arith.constant 7 : i32
    %c8_i32_132 = arith.constant 8 : i32
    %391 = arith.muli %c7_i32_131, %c8_i32_132 : i32
    %c0_i32_133 = arith.constant 0 : i32
    %392 = arith.addi %c0_i32_133, %391 : i32
    %393 = tpu.assume_multiple %392, 8 : i32
    %394 = arith.index_cast %393 : i32 to index
    %c0_134 = arith.constant 0 : index
    %395 = vector.load %arg11[%394, %c0_134] : memref<128x128xf32, #tpu.memory_space<vmem>>, vector<8x128xf32>
    %cst_135 = arith.constant dense<0.000000e+00> : vector<8x128xf32>
    %396 = tpu.matmul %390, %228, %cst_135 {dimension_numbers = #tpu.dot_dimension_numbers<[1], [0], [0], [1], [0, 0, 1, 1], [], []>} : vector<8x32xf32>, vector<32x128xf32>, vector<8x128xf32> -> vector<8x128xf32>
    %397 = arith.addf %395, %396 : vector<8x128xf32>
    %398 = arith.negf %397 : vector<8x128xf32>
    %399 = math.exp %398 : vector<8x128xf32>
    %cst_136 = arith.constant 1.000000e+00 : f32
    %400 = vector.broadcast %cst_136 : f32 to vector<8x128xf32>
    %401 = arith.addf %400, %399 : vector<8x128xf32>
    %402 = arith.divf %400, %401 : vector<8x128xf32>
    %403 = math.tanh %397 : vector<8x128xf32>
    %404 = vector.extract_strided_slice %403 {offsets = [0, 96], sizes = [8, 32], strides = [1, 1]} : vector<8x128xf32> to vector<8x32xf32>
    %405 = vector.extract_strided_slice %402 {offsets = [0, 0], sizes = [8, 32], strides = [1, 1]} : vector<8x128xf32> to vector<8x32xf32>
    %406 = vector.extract_strided_slice %402 {offsets = [0, 32], sizes = [8, 32], strides = [1, 1]} : vector<8x128xf32> to vector<8x32xf32>
    %407 = vector.extract_strided_slice %402 {offsets = [0, 64], sizes = [8, 32], strides = [1, 1]} : vector<8x128xf32> to vector<8x32xf32>
    %408 = arith.mulf %406, %388 : vector<8x32xf32>
    %409 = arith.mulf %405, %404 : vector<8x32xf32>
    %410 = arith.addf %408, %409 : vector<8x32xf32>
    %411 = math.tanh %410 : vector<8x32xf32>
    %412 = arith.mulf %407, %411 : vector<8x32xf32>
    %c8_i32_137 = arith.constant 8 : i32
    %c0_138 = arith.constant 0 : index
    %c0_139 = arith.constant 0 : index
    %413 = vector.load %arg8[%c0_138, %c0_139] : memref<32x128xf32, #tpu.memory_space<vmem>>, vector<32x128xf32>
    %cst_140 = arith.constant dense<0.000000e+00> : vector<8x128xf32>
    %414 = tpu.matmul %412, %413, %cst_140 {dimension_numbers = #tpu.dot_dimension_numbers<[1], [0], [0], [1], [0, 0, 1, 1], [], []>} : vector<8x32xf32>, vector<32x128xf32>, vector<8x128xf32> -> vector<8x128xf32>
    %c0_141 = arith.constant 0 : index
    %c0_142 = arith.constant 0 : index
    %415 = vector.load %arg9[%c0_141, %c0_142] : memref<1x128xf32, #tpu.memory_space<vmem>>, vector<1x128xf32>
    %416 = vector.broadcast %415 : vector<1x128xf32> to vector<8x128xf32>
    %417 = arith.addf %414, %416 : vector<8x128xf32>
    %c0_143 = arith.constant 0 : index
    %c0_144 = arith.constant 0 : index
    %418 = vector.load %arg10[%c0_143, %c0_144] : memref<8x128xf32, #tpu.memory_space<vmem>>, vector<8x128xf32>
    tpu.vector_store %arg10[%c0_143, %c0_144], %417 {strides = array<i32>} : memref<8x128xf32, #tpu.memory_space<vmem>>, vector<8x128xf32>,
    return
  }
  func.func @transform_0(%arg0: i32) -> (i32, i32, i32) {
    %c0_i32 = arith.constant 0 : i32
    %c0_i32_0 = arith.constant 0 : i32
    %c0_i32_1 = arith.constant 0 : i32
    return %c0_i32, %arg0, %c0_i32_0 : i32, i32, i32
  }
  func.func @transform_1(%arg0: i32) -> (i32, i32) {
    %c0_i32 = arith.constant 0 : i32
    %c0_i32_0 = arith.constant 0 : i32
    %c0_i32_1 = arith.constant 0 : i32
    return %c0_i32, %c0_i32_0 : i32, i32
  }
  func.func @transform_2(%arg0: i32) -> (i32, i32) {
    %c0_i32 = arith.constant 0 : i32
    %c0_i32_0 = arith.constant 0 : i32
    %c0_i32_1 = arith.constant 0 : i32
    return %c0_i32, %c0_i32_0 : i32, i32
  }
  func.func @transform_3(%arg0: i32) -> (i32, i32) {
    %c0_i32 = arith.constant 0 : i32
    %c0_i32_0 = arith.constant 0 : i32
    %c0_i32_1 = arith.constant 0 : i32
    return %c0_i32, %c0_i32_0 : i32, i32
  }
  func.func @transform_4(%arg0: i32) -> (i32, i32) {
    %c0_i32 = arith.constant 0 : i32
    %c0_i32_0 = arith.constant 0 : i32
    %c0_i32_1 = arith.constant 0 : i32
    return %c0_i32, %c0_i32_0 : i32, i32
  }
  func.func @transform_5(%arg0: i32) -> (i32, i32) {
    %c0_i32 = arith.constant 0 : i32
    %c0_i32_0 = arith.constant 0 : i32
    %c0_i32_1 = arith.constant 0 : i32
    return %c0_i32, %c0_i32_0 : i32, i32
  }
  func.func @transform_6(%arg0: i32) -> (i32, i32) {
    %c0_i32 = arith.constant 0 : i32
    %c0_i32_0 = arith.constant 0 : i32
    %c0_i32_1 = arith.constant 0 : i32
    return %c0_i32, %c0_i32_0 : i32, i32
  }
  func.func @transform_7(%arg0: i32) -> (i32, i32) {
    %c0_i32 = arith.constant 0 : i32
    %c0_i32_0 = arith.constant 0 : i32
    %c0_i32_1 = arith.constant 0 : i32
    return %c0_i32, %c0_i32_0 : i32, i32
  }
  func.func @transform_8(%arg0: i32) -> (i32, i32) {
    %c0_i32 = arith.constant 0 : i32
    %c0_i32_0 = arith.constant 0 : i32
    %c0_i32_1 = arith.constant 0 : i32
    return %c0_i32, %c0_i32_0 : i32, i32
  }
  func.func @transform_9(%arg0: i32) -> (i32, i32) {
    %c0_i32 = arith.constant 0 : i32
    %c0_i32_0 = arith.constant 0 : i32
    return %arg0, %c0_i32 : i32, i32
  }
}

</mosaic_0001>

<bundles_post_ra>
// kernel: tpu_custom_call.1
= control target key start
LH: loop header
LB: loop body
LE: loop exit
PB: predicated region body
PF: predicated region fallthrough
CT: control target
= control target key end

     0   :  { %14 = vsyncpa [#allocation5], 0  ;;  %s2124_s0 = inlined_call_operand.hbm [shape: f32[8,8,16], index: 0, kind: input, shape index: {}]   ;;  %s2125_s1 = inlined_call_operand.hbm [shape: f32[16,128], index: 1, kind: input, shape index: {}]   ;;  %s2126_s2 = inlined_call_operand.hbm [shape: f32[32,128], index: 2, kind: input, shape index: {}]   ;;  %s2127_s3 = inlined_call_operand.vmem [shape: f32[1,128], index: 3, kind: input, shape index: {}]   ;;  %s2128_s4 = inlined_call_operand.hbm [shape: f32[32,128], index: 4, kind: input, shape index: {}]   ;;  %s2129_s5 = inlined_call_operand.hbm [shape: f32[32,128], index: 5, kind: input, shape index: {}]   ;;  %s2130_s6 = inlined_call_operand.vmem [shape: f32[1,128], index: 6, kind: input, shape index: {}]   ;;  %s2131_s7 = inlined_call_operand.hbm [shape: f32[32,128], index: 7, kind: input, shape index: {}]   ;;  %s2132_s8 = inlined_call_operand.vmem [shape: f32[1,128], index: 8, kind: input, shape index: {}]   ;;  %s2133_s9 = inlined_call_operand.hbm [shape: f32[8,128], index: 9, kind: output, shape index: {}]  }
   0x1   :  { %15 = vsyncpa [#allocation8], 0 }
   0x2   :  { %16 = vsyncpa [#allocation11], 0 }
   0x3   :  { %17 = vsyncpa [#allocation14], 0 }
   0x4   :  { %18 = vsyncpa [#allocation6], 0  ;;  %s36_s11 = sshll.u32 %s2125_s1, 4  ;;  %s1786_s12 = smov [#allocation7]   ;;  %s37_s11 = int_to_ptr.hbm [resolvable:$true] %s36_s11 }
   0x5   :  { %s38_s13 = sshll.u32 %s1786_s12, 4  ;;  %s64_s16 = sshll.u32 %s2128_s4, 4  ;;  %s39_s13 = int_to_ptr.vmem [resolvable:$true] %s38_s13  ;;  %s65_s16 = int_to_ptr.hbm [resolvable:$true] %s64_s16 }
   0x6   :  { %s1787_s17 = smov 128   ;;  %s1788_s18 = smov 8  }
   0x7   :  { %44 = dma.hbm_to_vmem [thread:$0]  %s37_s11, 256, %s39_s13, [#allocation8], %s1787_s17, %s1787_s17, %s1788_s18  }
   0x8   :  { %s1789_s19 = smov [#allocation10]   ;;  %s23_s1 = sshll.u32 %s2124_s0, 4  ;;  %s24_s1 = int_to_ptr.hbm [resolvable:$true] %s23_s1 }
   0x9   :  { %s66_s20 = sshll.u32 %s1789_s19, 4  ;;  %s49_s24 = sshll.u32 %s2126_s2, 4  ;;  %s67_s20 = int_to_ptr.vmem [resolvable:$true] %s66_s20  ;;  %s50_s24 = int_to_ptr.hbm [resolvable:$true] %s49_s24 }
   0xa   :  { %72 = dma.hbm_to_vmem [thread:$0]  %s65_s16, 512, %s67_s20, [#allocation11], %s1787_s17, %s1787_s17, %s1788_s18  }
   0xb   :  { %s1790_s25 = smov [#allocation4]   ;;  %s1791_s27 = smov [#allocation9]  }
   0xc   :  { %s25_s26 = sshll.u32 %s1790_s25, 4  ;;  %s51_s0 = sshll.u32 %s1791_s27, 4  ;;  %s26_s26 = int_to_ptr.vmem [resolvable:$true] %s25_s26  ;;  %s52_s0 = int_to_ptr.vmem [resolvable:$true] %s51_s0 }
   0xd   :  { %31 = dma.hbm_to_vmem [thread:$0]  %s24_s1, 1024, %s26_s26, [#allocation5], %s1787_s17, %s1787_s17, %s1788_s18  }
   0xe   :  { %s77_s30 = sshll.u32 %s2129_s5, 4  ;;  %s92_s11 = sshll.u32 %s2131_s7, 4  ;;  %s78_s30 = int_to_ptr.hbm [resolvable:$true] %s77_s30  ;;  %s93_s11 = int_to_ptr.hbm [resolvable:$true] %s92_s11 }
   0xf   :  { %57 = dma.hbm_to_vmem [thread:$0]  %s50_s24, 512, %s52_s0, [#allocation8], %s1787_s17, %s1787_s17, %s1788_s18  }
  0x10   :  { %s1792_s12 = smov [#allocation12]   ;;  %s1793_s14 = smov [#allocation13]  }
  0x11   :  { %s79_s13 = sshll.u32 %s1792_s12, 4  ;;  %s94_s5 = sshll.u32 %s1793_s14, 4  ;;  %s80_s13 = int_to_ptr.vmem [resolvable:$true] %s79_s13  ;;  %s95_s5 = int_to_ptr.vmem [resolvable:$true] %s94_s5 }
  0x12   :  { %85 = dma.hbm_to_vmem [thread:$0]  %s78_s30, 512, %s80_s13, [#allocation11], %s1787_s17, %s1787_s17, %s1788_s18  }
  0x13   :  { %100 = dma.hbm_to_vmem [thread:$0]  %s93_s11, 512, %s95_s5, [#allocation14], %s1787_s17, %s1787_s17, %s1788_s18  }
  0x14   :  { %1776 = dma.done.wait [#allocation5], 1024  }
  0x15   :  { %1777 = vsyncadd [#allocation5], 4294966272 }
  0x16   :  { %1778 = dma.done.wait [#allocation8], 768  }
  0x17   :  { %1779 = vsyncadd [#allocation8], 4294966528 }
  0x18   :  { %1780 = dma.done.wait [#allocation11], 1024  }
  0x19   :  { %1781 = vsyncadd [#allocation11], 4294966272 }
  0x1a   :  { %1782 = dma.done.wait [#allocation14], 512  }
  0x1b   :  { %1783 = vsyncadd [#allocation14], 4294966784  ;;  %v1884_v0 = vld [vmem:[#allocation9 + $0x18] sm:$0xff]  ;;  %v1886_v2 = vld [vmem:[#allocation9 + $0x10] sm:$0xff]  ;;  %vm145_vm0 = vcmask 130048   ;;  %v1794_v7 = vmov 0.0  }
  0x1c   :  { %v128_v1 = vld [vmem:[#allocation7 + $0x8] sm:$0xff]  ;;  %236 = vmatpush.msra.mxu1 %v1884_v0  ;;  %v127_v3 = vld [vmem:[#allocation7] sm:$0xff]  ;;  %v1889_v5 = vld [vmem:[#allocation9 + $0x8] sm:$0xff]  ;;  %303 = vmatpush.msra.mxu2 %v1884_v0  ;;  %s1795_s16 = smov 32   ;;  %s1796_s17 = smov 64   ;;  %vm220_vm5 = vcmask 261120  }
  0x1d   :  { %184 = vmatpush.msra.mxu0 %v128_v1  ;;  %v134_v4 = vld [vmem:[#allocation4] sm:$0xff]  ;;  %v1894_v6 = vld [vmem:[#allocation9] sm:$0xff]  ;;  %v766_v35 = vld [vmem:[#allocation10 + $0x18] sm:$0xff]  ;;  %s1797_s22 = smov [#allocation15]   ;;  %s1404_s24 = sshll.u32 %s2133_s9, 4  ;;  %s1405_s24 = int_to_ptr.hbm [resolvable:$true] %s1404_s24 }
  0x1e   :  { %237 = vmatpush.msra.mxu1 %v1886_v2  ;;  %304 = vmatpush.msra.mxu2 %v1886_v2  ;;  %v1921_v8 = vld [vmem:[%s2127_s3] ss:$0 sm:$0xff]  ;;  %v135_v37 = vld [vmem:[#allocation4 + $0x8] sm:$0xff]  ;;  %v764_v38 = vld [vmem:[#allocation10 + $0x8] sm:$0xff]  ;;  %s1402_s1 = sshll.u32 %s1797_s22, 4  ;;  %s1403_s1 = int_to_ptr.vmem [resolvable:$true] %s1402_s1 }
  0x1f   :  { %185 = vmatpush.msra.mxu0 %v127_v3  ;;  %v765_v36 = vld [vmem:[#allocation10 + $0x10] sm:$0xff]  ;;  %819 = vmatpush.msra.mxu3 %v766_v35  ;;  %v763_v39 = vld [vmem:[#allocation10] sm:$0xff] }
  0x20   :  { %1417 = vmatmul.msk.f32.vlgmr.msra.gmra.mxu0 %vm145_vm0, %v134_v4  ;;  %238 = vmatpush.msra.mxu1 %v1889_v5 }
  0x21   :  { %575 = vmatpush.msrb.mxu0 %v1884_v0  ;;  %305 = vmatpush.msra.mxu2 %v1889_v5 }
  0x22   :  { %239 = vmatpush.msra.mxu1 %v1894_v6  ;;  %820 = vmatpush.msra.mxu3 %v765_v36 }
  0x23   :  { %576 = vmatpush.msrb.mxu0 %v1886_v2  ;;  %240 = vmatmul.f32.vlgmr.msra.gmra.mxu1 %v1794_v7 }
  0x24   :  { %306 = vmatpush.msra.mxu2 %v1894_v6  ;;  %439 = vmatpush.msrb.mxu1 %v1884_v0 }
  0x25   :  { %577 = vmatpush.msrb.mxu0 %v1889_v5  ;;  %821 = vmatpush.msra.mxu3 %v764_v38 }
  0x26   :  { %371 = vmatpush.msrb.mxu2 %v1884_v0  ;;  %440 = vmatpush.msrb.mxu1 %v1886_v2 }
  0x27   :  { %578 = vmatpush.msrb.mxu0 %v1894_v6  ;;  %822 = vmatpush.msra.mxu3 %v763_v39 }
  0x28   :  { %372 = vmatpush.msrb.mxu2 %v1886_v2  ;;  %441 = vmatpush.msrb.mxu1 %v1889_v5 }
  0x29   :  { %1418 = vmatmul.msk.f32.gmra.mxu0 %vm145_vm0, %v135_v37 }
  0x2a   :  { %373 = vmatpush.msrb.mxu2 %v1889_v5  ;;  %442 = vmatpush.msrb.mxu1 %v1894_v6 }
  0x2c   :  { %374 = vmatpush.msrb.mxu2 %v1894_v6  ;;  %643 = vmatpush.msra.mxu1 %v1884_v0 }
  0x2e   :  { %644 = vmatpush.msra.mxu1 %v1886_v2 }
  0x30   :  { %645 = vmatpush.msra.mxu1 %v1889_v5 }
  0x32   :  { %646 = vmatpush.msra.mxu1 %v1894_v6 }
  0x9d   :  { %v187_v9 = vpop.f32.mrf.mxu0 }
  0x9e   :  { %v188_v10 = vadd.f32 %v1921_v8, %v187_v9 }
  0xa0   :  { %v241_v11 = vpop.f32.mrf.mxu1 }
  0xa1   :  { %v244_v12 = vadd.f32 %v241_v11, %v188_v10  ;;  %v136_v10 = vld [vmem:[#allocation4 + $0x10] sm:$0xff] }
  0xa2   :  { %1419 = vmatmul.msk.f32.gmra.mxu0 %vm145_vm0, %v136_v10 }
  0xa3   :  { %1479 = vtanh.f32 %v244_v12  ;;  %v1425_v14 = vmul.f32 -1.442695, %v244_v12 }
  0xa5   :  { %1481 = vpow2.f32 %v1425_v14 }
  0xa6   :  { %v190_v42 = vpop.f32.mrf.mxu0 }
  0xa7   :  { %v191_v43 = vadd.f32 %v1921_v8, %v190_v42 }
  0xa9   :  { %v1480_v13 = vpop.eup %1479 }
  0xaa   :  { %267 = vrot.lane.b32.xlu0 %v1480_v13, %s1795_s16 }
  0xab   :  { %v1482_v15 = vpop.eup %1481 }
  0xac   :  { %v248_v16 = vadd.f32 1.0, %v1482_v15 }
  0xae   :  { %1483 = vrcp.f32 %v248_v16  ;;  %v260_v22 = vand.u32 2147483648, %v248_v16  ;;  %vm254_vm2 = vweird.f32 %v248_v16  ;;  %v258_v23 = vand.u32 2147483647, %v248_v16 }
  0xb0   :  { %v261_v25 = vor.u32 1.1754944e-38, %v260_v22  ;;  %vm259_vm4 = vcmp.eq.f32.partialorder %v258_v23, 8.507059e+37 }
  0xb4   :  { %v1484_v17 = vpop.eup %1483 }
  0xb5   :  { %v250_v18 = vmul.f32 %v1484_v17, %v248_v16  ;;  %vm255_vm1 = vweird.f32 %v1484_v17 }
  0xb6   :  { %vm256_vm3 = vmor %vm254_vm2, %vm255_vm1 }
  0xb7   :  { %v251_v19 = vsub.f32 1.0, %v250_v18 }
  0xb9   :  { %v252_v20 = vmul.f32 %v1484_v17, %v251_v19 }
  0xbb   :  { %v253_v21 = vadd.f32 %v1484_v17, %v252_v20 }
  0xbd   :  { %v257_v24 = vsel %vm256_vm3, %v1484_v17, %v253_v21 }
  0xbe   :  { %v262_v27 = vsel %vm259_vm4, %v261_v25, %v257_v24 }
  0xbf   :  { %v265_v29 = vmul.f32 0.0, %v262_v27 }
 0x11c   :  { %v268_v26 = vpop.permute.xlu0 %267 }
 0x11d   :  { %v270_v28 = vmul.f32 %v268_v26, %v262_v27 }
 0x11f   :  { %272 = vrot.lane.b32.xlu0 %v270_v28, %s1795_s16  ;;  %v193_v13 = vpop.f32.mrf.mxu0 }
 0x120   :  { %v194_v14 = vadd.f32 %v1921_v8, %v193_v13 }
 0x191   :  { %v273_v30 = vpop.permute.xlu0 %272 }
 0x192   :  { %v275_v31 = vadd.f32 %v273_v30, %v265_v29 }
 0x194   :  { %1485 = vtanh.f32 %v275_v31 }
 0x19a   :  { %v1486_v32 = vpop.eup %1485 }
 0x19b   :  { %278 = vrot.lane.b32.xlu1 %v1486_v32, %s1795_s16 }
 0x20d   :  { %v279_v33 = vpop.permute.xlu1 %278 }
 0x20e   :  { %v281_v34 = vmul.f32 %v279_v33, %v262_v27  ;;  %v137_v33 = vld [vmem:[#allocation4 + $0x18] sm:$0xff] }
 0x20f   :  { %1420 = vmatmul.msk.f32.gmra.mxu0 %vm145_vm0, %v137_v33 }
 0x210   :  { %283 = vrot.lane.b32.xlu1 %v281_v34, %s1796_s17 }
 0x282   :  { %v284_v40 = vpop.permute.xlu1 %283 }
 0x283   :  { %286 = vst.msk [vmem:[#allocation3] sm:$0xff] %vm220_vm5, %v284_v40  ;;  %1426 = vmatmul.msk.f32.vlgmr.msra.gmra.mxu2 %vm220_vm5, %v284_v40 }
 0x284   :  { %507 = vmatpush.msra.mxu2 %v1884_v0 }
 0x286   :  { %508 = vmatpush.msra.mxu2 %v1886_v2 }
 0x288   :  { %509 = vmatpush.msra.mxu2 %v1889_v5 }
 0x28a   :  { %v772_v41 = vld [vmem:[#allocation3] sm:$0xff]  ;;  %510 = vmatpush.msra.mxu2 %v1894_v6 }
 0x28b   :  { %1440 = vmatmul.msk.f32.vlgmr.msra.gmra.mxu3 %vm220_vm5, %v772_v41 }
 0x28c   :  { %v196_v38 = vpop.f32.mrf.mxu0 }
 0x28d   :  { %v197_v39 = vadd.f32 %v1921_v8, %v196_v38 }
 0x306   :  { %v308_v44 = vpop.f32.mrf.mxu2 }
 0x307   :  { %v311_v45 = vadd.f32 %v308_v44, %v191_v43 }
 0x309   :  { %1487 = vtanh.f32 %v311_v45  ;;  %v1427_v47 = vmul.f32 -1.442695, %v311_v45 }
 0x30b   :  { %1489 = vpow2.f32 %v1427_v47 }
 0x30f   :  { %v1488_v46 = vpop.eup %1487 }
 0x310   :  { %334 = vrot.lane.b32.xlu2 %v1488_v46, %s1795_s16 }
 0x311   :  { %v1490_v48 = vpop.eup %1489 }
 0x312   :  { %v315_v49 = vadd.f32 1.0, %v1490_v48 }
 0x314   :  { %1491 = vrcp.f32 %v315_v49  ;;  %v327_v55 = vand.u32 2147483648, %v315_v49  ;;  %vm321_vm7 = vweird.f32 %v315_v49  ;;  %v325_v56 = vand.u32 2147483647, %v315_v49 }
 0x316   :  { %v328_v58 = vor.u32 1.1754944e-38, %v327_v55  ;;  %vm326_vm9 = vcmp.eq.f32.partialorder %v325_v56, 8.507059e+37 }
 0x31a   :  { %v1492_v50 = vpop.eup %1491 }
 0x31b   :  { %v317_v51 = vmul.f32 %v1492_v50, %v315_v49  ;;  %vm322_vm6 = vweird.f32 %v1492_v50 }
 0x31c   :  { %vm323_vm8 = vmor %vm321_vm7, %vm322_vm6 }
 0x31d   :  { %v318_v52 = vsub.f32 1.0, %v317_v51 }
 0x31f   :  { %v319_v53 = vmul.f32 %v1492_v50, %v318_v52 }
 0x321   :  { %v320_v54 = vadd.f32 %v1492_v50, %v319_v53 }
 0x323   :  { %v324_v57 = vsel %vm323_vm8, %v1492_v50, %v320_v54 }
 0x324   :  { %v329_v60 = vsel %vm326_vm9, %v328_v58, %v324_v57 }
 0x325   :  { %v332_v62 = vmul.f32 %v329_v60, %v275_v31 }
 0x36a   :  { %v335_v59 = vpop.permute.xlu2 %334 }
 0x36b   :  { %v337_v61 = vmul.f32 %v335_v59, %v329_v60 }
 0x36d   :  { %339 = vrot.lane.b32.xlu2 %v337_v61, %s1795_s16 }
 0x3c7   :  { %v340_v63 = vpop.permute.xlu2 %339 }
 0x3c8   :  { %v342_v1 = vadd.f32 %v340_v63, %v332_v62 }
 0x3ca   :  { %1493 = vtanh.f32 %v342_v1 }
 0x3d0   :  { %v1494_v3 = vpop.eup %1493 }
 0x3d1   :  { %345 = vrot.lane.b32.xlu0 %v1494_v3, %s1795_s16 }
 0x443   :  { %v346_v4 = vpop.permute.xlu0 %345 }
 0x444   :  { %v348_v9 = vmul.f32 %v346_v4, %v329_v60 }
 0x446   :  { %350 = vrot.lane.b32.xlu1 %v348_v9, %s1796_s17 }
 0x4b8   :  { %v351_v11 = vpop.permute.xlu1 %350 }
 0x4b9   :  { %354 = vst.msk [vmem:[#allocation3 + $0x8] sm:$0xff] %vm220_vm5, %v351_v11  ;;  %1428 = vmatmul.msk.f32.vlgmr.msrb.gmra.mxu2 %vm220_vm5, %v351_v11 }
 0x4ba   :  { %711 = vmatpush.msrb.mxu2 %v1884_v0 }
 0x4bc   :  { %712 = vmatpush.msrb.mxu2 %v1886_v2 }
 0x4be   :  { %713 = vmatpush.msrb.mxu2 %v1889_v5 }
 0x4c0   :  { %v773_v12 = vld [vmem:[#allocation3 + $0x8] sm:$0xff]  ;;  %714 = vmatpush.msrb.mxu2 %v1894_v6 }
 0x4c1   :  { %1441 = vmatmul.msk.f32.gmra.mxu3 %vm220_vm5, %v773_v12 }
 0x53c   :  { %v376_v15 = vpop.f32.mrf.mxu2 }
 0x53d   :  { %v379_v16 = vadd.f32 %v376_v15, %v194_v14 }
 0x53f   :  { %1495 = vtanh.f32 %v379_v16  ;;  %v1429_v18 = vmul.f32 -1.442695, %v379_v16 }
 0x541   :  { %1497 = vpow2.f32 %v1429_v18 }
 0x545   :  { %v1496_v17 = vpop.eup %1495 }
 0x546   :  { %402 = vrot.lane.b32.xlu2 %v1496_v17, %s1795_s16 }
 0x547   :  { %v1498_v0 = vpop.eup %1497 }
 0x548   :  { %v383_v2 = vadd.f32 1.0, %v1498_v0 }
 0x54a   :  { %1499 = vrcp.f32 %v383_v2  ;;  %v395_v22 = vand.u32 2147483648, %v383_v2  ;;  %vm389_vm11 = vweird.f32 %v383_v2  ;;  %v393_v23 = vand.u32 2147483647, %v383_v2 }
 0x54c   :  { %v396_v25 = vor.u32 1.1754944e-38, %v395_v22  ;;  %vm394_vm13 = vcmp.eq.f32.partialorder %v393_v23, 8.507059e+37 }
 0x550   :  { %v1500_v5 = vpop.eup %1499 }
 0x551   :  { %v385_v19 = vmul.f32 %v1500_v5, %v383_v2  ;;  %vm390_vm10 = vweird.f32 %v1500_v5 }
 0x552   :  { %vm391_vm12 = vmor %vm389_vm11, %vm390_vm10 }
 0x553   :  { %v386_v20 = vsub.f32 1.0, %v385_v19 }
 0x555   :  { %v387_v6 = vmul.f32 %v1500_v5, %v386_v20 }
 0x557   :  { %v388_v21 = vadd.f32 %v1500_v5, %v387_v6 }
 0x559   :  { %v392_v24 = vsel %vm391_vm12, %v1500_v5, %v388_v21 }
 0x55a   :  { %v397_v27 = vsel %vm394_vm13, %v396_v25, %v392_v24 }
 0x55b   :  { %v400_v29 = vmul.f32 %v397_v27, %v342_v1  ;;  %v138_v1 = vld [vmem:[#allocation4 + $0x20] sm:$0xff] }
 0x55c   :  { %1421 = vmatmul.msk.f32.gmra.mxu0 %vm145_vm0, %v138_v1  ;;  %v1990_v1 = vld [vmem:[#allocation12 + $0x18] sm:$0xff] }
 0x5a0   :  { %v403_v26 = vpop.permute.xlu2 %402 }
 0x5a1   :  { %v405_v28 = vmul.f32 %v403_v26, %v397_v27 }
 0x5a3   :  { %407 = vrot.lane.b32.xlu0 %v405_v28, %s1795_s16 }
 0x5d9   :  { %v199_v9 = vpop.f32.mrf.mxu0 }
 0x5da   :  { %v200_v10 = vadd.f32 %v1921_v8, %v199_v9  ;;  %v2000_v9 = vld [vmem:[#allocation12] sm:$0xff] }
 0x615   :  { %v408_v30 = vpop.permute.xlu0 %407 }
 0x616   :  { %v410_v31 = vadd.f32 %v408_v30, %v400_v29  ;;  %v139_v29 = vld [vmem:[#allocation4 + $0x28] sm:$0xff]  ;;  %v140_v30 = vld [vmem:[#allocation4 + $0x30] sm:$0xff] }
 0x617   :  { %1422 = vmatmul.msk.f32.gmra.mxu0 %vm145_vm0, %v139_v29 }
 0x618   :  { %1501 = vtanh.f32 %v410_v31 }
 0x61e   :  { %v1502_v32 = vpop.eup %1501 }
 0x61f   :  { %413 = vrot.lane.b32.xlu1 %v1502_v32, %s1795_s16  ;;  %1423 = vmatmul.msk.f32.gmra.mxu0 %vm145_vm0, %v140_v30 }
 0x691   :  { %v414_v34 = vpop.permute.xlu1 %413 }
 0x692   :  { %v416_v35 = vmul.f32 %v414_v34, %v397_v27 }
 0x694   :  { %418 = vrot.lane.b32.xlu2 %v416_v35, %s1796_s17 }
 0x6ee   :  { %v419_v36 = vpop.permute.xlu2 %418 }
 0x6ef   :  { %422 = vst.msk [vmem:[#allocation3 + $0x10] sm:$0xff] %vm220_vm5, %v419_v36  ;;  %1430 = vmatmul.msk.f32.vlgmr.msrb.gmra.mxu1 %vm220_vm5, %v419_v36  ;;  %v202_v36 = vpop.f32.mrf.mxu0 }
 0x6f0   :  { %869 = vmatpush.msrb.mxu1 %v1990_v1 }
 0x6f6   :  { %v774_v37 = vld [vmem:[#allocation3 + $0x10] sm:$0xff] }
 0x6f7   :  { %1442 = vmatmul.msk.f32.gmra.mxu3 %vm220_vm5, %v774_v37  ;;  %v1978_v37 = vpop.f32.mrf.mxu0 }
 0x76c   :  { %v444_v40 = vpop.f32.mrf.mxu1 }
 0x76d   :  { %v447_v41 = vadd.f32 %v444_v40, %v197_v39  ;;  %v203_v39 = vadd.f32 %v1921_v8, %v202_v36 }
 0x76f   :  { %1503 = vtanh.f32 %v447_v41  ;;  %v1431_v43 = vmul.f32 -1.442695, %v447_v41 }
 0x771   :  { %1505 = vpow2.f32 %v1431_v43 }
 0x775   :  { %v1504_v42 = vpop.eup %1503 }
 0x776   :  { %470 = vrot.lane.b32.xlu0 %v1504_v42, %s1795_s16 }
 0x777   :  { %v1506_v44 = vpop.eup %1505 }
 0x778   :  { %v451_v45 = vadd.f32 1.0, %v1506_v44 }
 0x77a   :  { %1507 = vrcp.f32 %v451_v45  ;;  %v463_v51 = vand.u32 2147483648, %v451_v45  ;;  %vm457_vm15 = vweird.f32 %v451_v45  ;;  %v461_v52 = vand.u32 2147483647, %v451_v45 }
 0x77c   :  { %v464_v54 = vor.u32 1.1754944e-38, %v463_v51  ;;  %vm462_vm2 = vcmp.eq.f32.partialorder %v461_v52, 8.507059e+37 }
 0x780   :  { %v1508_v46 = vpop.eup %1507 }
 0x781   :  { %v453_v47 = vmul.f32 %v1508_v46, %v451_v45  ;;  %vm458_vm14 = vweird.f32 %v1508_v46 }
 0x782   :  { %vm459_vm1 = vmor %vm457_vm15, %vm458_vm14 }
 0x783   :  { %v454_v48 = vsub.f32 1.0, %v453_v47 }
 0x785   :  { %v455_v49 = vmul.f32 %v1508_v46, %v454_v48 }
 0x787   :  { %v456_v50 = vadd.f32 %v1508_v46, %v455_v49 }
 0x789   :  { %v460_v53 = vsel %vm459_vm1, %v1508_v46, %v456_v50 }
 0x78a   :  { %v465_v56 = vsel %vm462_vm2, %v464_v54, %v460_v53 }
 0x78b   :  { %v468_v58 = vmul.f32 %v465_v56, %v410_v31  ;;  %v141_v31 = vld [vmem:[#allocation4 + $0x38] sm:$0xff] }
 0x78c   :  { %1424 = vmatmul.msk.f32.gmra.mxu0 %vm145_vm0, %v141_v31 }
 0x7e8   :  { %v471_v55 = vpop.permute.xlu0 %470 }
 0x7e9   :  { %v473_v57 = vmul.f32 %v471_v55, %v465_v56 }
 0x7eb   :  { %475 = vrot.lane.b32.xlu1 %v473_v57, %s1795_s16 }
 0x809   :  { %v1980_v38 = vpop.f32.mrf.mxu0 }
 0x85d   :  { %v476_v59 = vpop.permute.xlu1 %475 }
 0x85e   :  { %v478_v60 = vadd.f32 %v476_v59, %v468_v58 }
 0x860   :  { %1509 = vtanh.f32 %v478_v60 }
 0x866   :  { %v1510_v61 = vpop.eup %1509 }
 0x867   :  { %481 = vrot.lane.b32.xlu2 %v1510_v61, %s1795_s16 }
 0x8c1   :  { %v482_v62 = vpop.permute.xlu2 %481 }
 0x8c2   :  { %v484_v63 = vmul.f32 %v482_v62, %v465_v56 }
 0x8c4   :  { %486 = vrot.lane.b32.xlu0 %v484_v63, %s1796_s17 }
 0x936   :  { %v487_v3 = vpop.permute.xlu0 %486 }
 0x937   :  { %490 = vst.msk [vmem:[#allocation3 + $0x18] sm:$0xff] %vm220_vm5, %v487_v3  ;;  %1432 = vmatmul.msk.f32.vlgmr.msra.gmra.mxu2 %vm220_vm5, %v487_v3  ;;  %v1992_v3 = vld [vmem:[#allocation12 + $0x10] sm:$0xff] }
 0x938   :  { %933 = vmatpush.msra.mxu2 %v1990_v1  ;;  %870 = vmatpush.msrb.mxu1 %v1992_v3 }
 0x93a   :  { %934 = vmatpush.msra.mxu2 %v1992_v3 }
 0x93e   :  { %v775_v4 = vld [vmem:[#allocation3 + $0x18] sm:$0xff] }
 0x93f   :  { %1443 = vmatmul.msk.f32.gmra.mxu3 %vm220_vm5, %v775_v4  ;;  %v1996_v4 = vld [vmem:[#allocation12 + $0x8] sm:$0xff] }
 0x940   :  { %871 = vmatpush.msrb.mxu1 %v1996_v4  ;;  %935 = vmatpush.msra.mxu2 %v1996_v4 }
 0x942   :  { %872 = vmatpush.msrb.mxu1 %v2000_v9  ;;  %936 = vmatpush.msra.mxu2 %v2000_v9 }
 0x9ba   :  { %v512_v11 = vpop.f32.mrf.mxu2 }
 0x9bb   :  { %v515_v12 = vadd.f32 %v512_v11, %v200_v10 }
 0x9bd   :  { %1511 = vtanh.f32 %v515_v12  ;;  %v1433_v14 = vmul.f32 -1.442695, %v515_v12  ;;  %v206_v12 = vadd.f32 %v1921_v8, %v1978_v37 }
 0x9bf   :  { %1513 = vpow2.f32 %v1433_v14 }
 0x9c3   :  { %v1512_v13 = vpop.eup %1511 }
 0x9c4   :  { %538 = vrot.lane.b32.xlu1 %v1512_v13, %s1795_s16 }
 0x9c5   :  { %v1514_v15 = vpop.eup %1513 }
 0x9c6   :  { %v519_v16 = vadd.f32 1.0, %v1514_v15  ;;  %v2023_v15 = vld [vmem:[%s2130_s6] ss:$0 sm:$0xff] }
 0x9c8   :  { %1515 = vrcp.f32 %v519_v16  ;;  %v531_v19 = vand.u32 2147483648, %v519_v16  ;;  %vm525_vm4 = vweird.f32 %v519_v16  ;;  %v529_v20 = vand.u32 2147483647, %v519_v16 }
 0x9ca   :  { %v532_v21 = vor.u32 1.1754944e-38, %v531_v19  ;;  %vm530_vm7 = vcmp.eq.f32.partialorder %v529_v20, 8.507059e+37 }
 0x9ce   :  { %v1516_v17 = vpop.eup %1515 }
 0x9cf   :  { %v521_v18 = vmul.f32 %v1516_v17, %v519_v16  ;;  %vm526_vm3 = vweird.f32 %v1516_v17 }
 0x9d0   :  { %vm527_vm6 = vmor %vm525_vm4, %vm526_vm3 }
 0x9d1   :  { %v522_v0 = vsub.f32 1.0, %v521_v18 }
 0x9d3   :  { %v523_v2 = vmul.f32 %v1516_v17, %v522_v0 }
 0x9d5   :  { %v524_v5 = vadd.f32 %v1516_v17, %v523_v2 }
 0x9d7   :  { %v528_v6 = vsel %vm527_vm6, %v1516_v17, %v524_v5 }
 0x9d8   :  { %v533_v23 = vsel %vm530_vm7, %v532_v21, %v528_v6 }
 0x9d9   :  { %v536_v25 = vmul.f32 %v533_v23, %v478_v60 }
 0xa36   :  { %v539_v22 = vpop.permute.xlu1 %538 }
 0xa37   :  { %v541_v24 = vmul.f32 %v539_v22, %v533_v23 }
 0xa39   :  { %543 = vrot.lane.b32.xlu2 %v541_v24, %s1795_s16 }
 0xa93   :  { %v544_v26 = vpop.permute.xlu2 %543 }
 0xa94   :  { %v546_v27 = vadd.f32 %v544_v26, %v536_v25 }
 0xa96   :  { %1517 = vtanh.f32 %v546_v27 }
 0xa9c   :  { %v1518_v28 = vpop.eup %1517 }
 0xa9d   :  { %549 = vrot.lane.b32.xlu0 %v1518_v28, %s1795_s16 }
 0xb0f   :  { %v550_v32 = vpop.permute.xlu0 %549 }
 0xb10   :  { %v552_v33 = vmul.f32 %v550_v32, %v533_v23 }
 0xb12   :  { %554 = vrot.lane.b32.xlu1 %v552_v33, %s1796_s17 }
 0xb84   :  { %v555_v34 = vpop.permute.xlu1 %554 }
 0xb85   :  { %558 = vst.msk [vmem:[#allocation3 + $0x20] sm:$0xff] %vm220_vm5, %v555_v34  ;;  %1434 = vmatmul.msk.f32.vlgmr.msrb.gmra.mxu0 %vm220_vm5, %v555_v34 }
 0xb8c   :  { %v776_v35 = vld [vmem:[#allocation3 + $0x20] sm:$0xff] }
 0xb8d   :  { %1444 = vmatmul.msk.f32.gmra.mxu3 %vm220_vm5, %v776_v35 }
 0xc02   :  { %v580_v40 = vpop.f32.mrf.mxu0 }
 0xc03   :  { %v583_v41 = vadd.f32 %v580_v40, %v203_v39 }
 0xc05   :  { %1519 = vtanh.f32 %v583_v41  ;;  %v1435_v43 = vmul.f32 -1.442695, %v583_v41 }
 0xc07   :  { %1521 = vpow2.f32 %v1435_v43 }
 0xc0b   :  { %v1520_v42 = vpop.eup %1519 }
 0xc0c   :  { %606 = vrot.lane.b32.xlu2 %v1520_v42, %s1795_s16 }
 0xc0d   :  { %v1522_v44 = vpop.eup %1521 }
 0xc0e   :  { %v587_v45 = vadd.f32 1.0, %v1522_v44 }
 0xc10   :  { %1523 = vrcp.f32 %v587_v45  ;;  %v599_v51 = vand.u32 2147483648, %v587_v45  ;;  %vm593_vm8 = vweird.f32 %v587_v45  ;;  %v597_v52 = vand.u32 2147483647, %v587_v45 }
 0xc12   :  { %v600_v54 = vor.u32 1.1754944e-38, %v599_v51  ;;  %vm598_vm10 = vcmp.eq.f32.partialorder %v597_v52, 8.507059e+37 }
 0xc16   :  { %v1524_v46 = vpop.eup %1523 }
 0xc17   :  { %v589_v47 = vmul.f32 %v1524_v46, %v587_v45  ;;  %vm594_vm0 = vweird.f32 %v1524_v46 }
 0xc18   :  { %vm595_vm9 = vmor %vm593_vm8, %vm594_vm0 }
 0xc19   :  { %v590_v48 = vsub.f32 1.0, %v589_v47 }
 0xc1b   :  { %v591_v49 = vmul.f32 %v1524_v46, %v590_v48 }
 0xc1d   :  { %v592_v50 = vadd.f32 %v1524_v46, %v591_v49 }
 0xc1f   :  { %v596_v53 = vsel %vm595_vm9, %v1524_v46, %v592_v50 }
 0xc20   :  { %v601_v56 = vsel %vm598_vm10, %v600_v54, %v596_v53 }
 0xc21   :  { %v604_v58 = vmul.f32 %v601_v56, %v546_v27 }
 0xc66   :  { %v607_v55 = vpop.permute.xlu2 %606 }
 0xc67   :  { %v609_v57 = vmul.f32 %v607_v55, %v601_v56 }
 0xc69   :  { %611 = vrot.lane.b32.xlu0 %v609_v57, %s1795_s16 }
 0xcdb   :  { %v612_v59 = vpop.permute.xlu0 %611 }
 0xcdc   :  { %v1985_v60 = vadd.f32 %v612_v59, %v604_v58 }
 0xcde   :  { %1525 = vtanh.f32 %v1985_v60 }
 0xce4   :  { %v1526_v61 = vpop.eup %1525 }
 0xce5   :  { %617 = vrot.lane.b32.xlu1 %v1526_v61, %s1795_s16 }
 0xd57   :  { %v618_v62 = vpop.permute.xlu1 %617 }
 0xd58   :  { %v620_v63 = vmul.f32 %v618_v62, %v601_v56 }
 0xd5a   :  { %622 = vrot.lane.b32.xlu2 %v620_v63, %s1796_s17 }
 0xdb4   :  { %v623_v10 = vpop.permute.xlu2 %622 }
 0xdb5   :  { %626 = vst.msk [vmem:[#allocation3 + $0x28] sm:$0xff] %vm220_vm5, %v623_v10  ;;  %1436 = vmatmul.msk.f32.vlgmr.msra.gmra.mxu1 %vm220_vm5, %v623_v10 }
 0xdb6   :  { %997 = vmatpush.msra.mxu1 %v1990_v1 }
 0xdb8   :  { %998 = vmatpush.msra.mxu1 %v1992_v3 }
 0xdba   :  { %999 = vmatpush.msra.mxu1 %v1996_v4 }
 0xdbc   :  { %v777_v11 = vld [vmem:[#allocation3 + $0x28] sm:$0xff]  ;;  %1000 = vmatpush.msra.mxu1 %v2000_v9 }
 0xdbd   :  { %1445 = vmatmul.msk.f32.gmra.mxu3 %vm220_vm5, %v777_v11  ;;  %873 = vmatmul.f32.vlgmr.msrb.gmra.mxu1 %v1794_v7  ;;  %v824_v7 = vpop.f32.mrf.mxu3 }
 0xdbe   :  { %1125 = vmatpush.msrb.mxu1 %v1990_v1  ;;  %v825_v16 = vadd.f32 %v2023_v15, %v824_v7 }
 0xdc0   :  { %1126 = vmatpush.msrb.mxu1 %v1992_v3 }
 0xdc2   :  { %1127 = vmatpush.msrb.mxu1 %v1996_v4 }
 0xdc4   :  { %1128 = vmatpush.msrb.mxu1 %v2000_v9 }
 0xdc5   :  { %v827_v63 = vpop.f32.mrf.mxu3 }
 0xdc6   :  { %v828_v10 = vadd.f32 %v2023_v15, %v827_v63 }
 0xe32   :  { %v648_v13 = vpop.f32.mrf.mxu1 }
 0xe33   :  { %v651_v14 = vadd.f32 %v648_v13, %v206_v12 }
 0xe35   :  { %1527 = vtanh.f32 %v651_v14  ;;  %v1437_v8 = vmul.f32 -1.442695, %v651_v14 }
 0xe3a   :  { %v874_v17 = vpop.f32.mrf.mxu1 }
 0xe3b   :  { %v1528_v18 = vpop.eup %1527  ;;  %v877_v0 = vadd.f32 %v874_v17, %v825_v16 }
 0xe3c   :  { %674 = vrot.lane.b32.xlu0 %v1528_v18, %s1795_s16 }
 0xe3d   :  { %1529 = vtanh.f32 %v877_v0  ;;  %v1448_v5 = vmul.f32 -1.442695, %v877_v0 }
 0xe3e   :  { %1531 = vpow2.f32 %v1437_v8 }
 0xe3f   :  { %1533 = vpow2.f32 %v1448_v5 }
 0xe43   :  { %v1530_v2 = vpop.eup %1529 }
 0xe44   :  { %900 = vrot.lane.b32.xlu1 %v1530_v2, %s1795_s16  ;;  %v1532_v19 = vpop.eup %1531 }
 0xe45   :  { %v655_v20 = vadd.f32 1.0, %v1532_v19  ;;  %v1534_v6 = vpop.eup %1533 }
 0xe46   :  { %v881_v21 = vadd.f32 1.0, %v1534_v6 }
 0xe47   :  { %1535 = vrcp.f32 %v655_v20  ;;  %v667_v30 = vand.u32 2147483648, %v655_v20  ;;  %vm661_vm12 = vweird.f32 %v655_v20  ;;  %v665_v31 = vand.u32 2147483647, %v655_v20 }
 0xe48   :  { %1537 = vrcp.f32 %v881_v21  ;;  %v893_v40 = vand.u32 2147483648, %v881_v21  ;;  %vm887_vm1 = vweird.f32 %v881_v21  ;;  %v891_v41 = vand.u32 2147483647, %v881_v21 }
 0xe49   :  { %v668_v34 = vor.u32 1.1754944e-38, %v667_v30  ;;  %vm666_vm14 = vcmp.eq.f32.partialorder %v665_v31, 8.507059e+37  ;;  %v830_v31 = vpop.f32.mrf.mxu3 }
 0xe4a   :  { %v894_v43 = vor.u32 1.1754944e-38, %v893_v40  ;;  %vm892_vm3 = vcmp.eq.f32.partialorder %v891_v41, 8.507059e+37 }
 0xe4d   :  { %v1536_v22 = vpop.eup %1535 }
 0xe4e   :  { %v657_v23 = vmul.f32 %v1536_v22, %v655_v20  ;;  %v1538_v25 = vpop.eup %1537  ;;  %vm662_vm11 = vweird.f32 %v1536_v22 }
 0xe4f   :  { %v883_v27 = vmul.f32 %v1538_v25, %v881_v21  ;;  %vm663_vm13 = vmor %vm661_vm12, %vm662_vm11  ;;  %vm888_vm15 = vweird.f32 %v1538_v25 }
 0xe50   :  { %v658_v24 = vsub.f32 1.0, %v657_v23  ;;  %vm889_vm2 = vmor %vm887_vm1, %vm888_vm15 }
 0xe51   :  { %v884_v29 = vsub.f32 1.0, %v883_v27 }
 0xe52   :  { %v659_v26 = vmul.f32 %v1536_v22, %v658_v24 }
 0xe53   :  { %v885_v33 = vmul.f32 %v1538_v25, %v884_v29 }
 0xe54   :  { %v660_v28 = vadd.f32 %v1536_v22, %v659_v26 }
 0xe55   :  { %v886_v39 = vadd.f32 %v1538_v25, %v885_v33 }
 0xe56   :  { %v664_v32 = vsel %vm663_vm13, %v1536_v22, %v660_v28 }
 0xe57   :  { %v669_v36 = vsel %vm666_vm14, %v668_v34, %v664_v32  ;;  %v890_v42 = vsel %vm889_vm2, %v1538_v25, %v886_v39  ;;  %v831_v32 = vadd.f32 %v2023_v15, %v830_v31 }
 0xe58   :  { %v895_v45 = vsel %vm892_vm3, %v894_v43, %v890_v42  ;;  %v672_v47 = vmul.f32 %v669_v36, %v1985_v60 }
 0xe59   :  { %v898_v51 = vmul.f32 0.0, %v895_v45 }
 0xeae   :  { %v675_v35 = vpop.permute.xlu0 %674 }
 0xeaf   :  { %v677_v37 = vmul.f32 %v675_v35, %v669_v36 }
 0xeb1   :  { %679 = vrot.lane.b32.xlu2 %v677_v37, %s1795_s16 }
 0xeb6   :  { %v901_v44 = vpop.permute.xlu1 %900 }
 0xeb7   :  { %v903_v46 = vmul.f32 %v901_v44, %v895_v45 }
 0xeb9   :  { %905 = vrot.lane.b32.xlu0 %v903_v46, %s1795_s16 }
 0xf0b   :  { %v680_v48 = vpop.permute.xlu2 %679 }
 0xf0c   :  { %v2031_v49 = vadd.f32 %v680_v48, %v672_v47 }
 0xf0e   :  { %1539 = vtanh.f32 %v2031_v49 }
 0xf14   :  { %v1540_v50 = vpop.eup %1539 }
 0xf15   :  { %685 = vrot.lane.b32.xlu1 %v1540_v50, %s1795_s16 }
 0xf2b   :  { %v906_v52 = vpop.permute.xlu0 %905 }
 0xf2c   :  { %v908_v53 = vadd.f32 %v906_v52, %v898_v51 }
 0xf2e   :  { %1541 = vtanh.f32 %v908_v53 }
 0xf34   :  { %v1542_v54 = vpop.eup %1541 }
 0xf35   :  { %911 = vrot.lane.b32.xlu2 %v1542_v54, %s1795_s16 }
 0xf87   :  { %v686_v55 = vpop.permute.xlu1 %685 }
 0xf88   :  { %v688_v56 = vmul.f32 %v686_v55, %v669_v36 }
 0xf8a   :  { %690 = vrot.lane.b32.xlu0 %v688_v56, %s1796_s17 }
 0xf8f   :  { %v912_v57 = vpop.permute.xlu2 %911 }
 0xf90   :  { %v914_v58 = vmul.f32 %v912_v57, %v895_v45 }
 0xf92   :  { %917 = vrot.lane.b32.xlu1 %v914_v58, %s1796_s17 }
 0xffc   :  { %v691_v59 = vpop.permute.xlu0 %690 }
 0xffd   :  { %694 = vst.msk [vmem:[#allocation3 + $0x30] sm:$0xff] %vm220_vm5, %v691_v59  ;;  %1438 = vmatmul.msk.f32.vlgmr.msrb.gmra.mxu2 %vm220_vm5, %v691_v59 }
 0xffe   :  { %1061 = vmatpush.msrb.mxu2 %v1990_v1 }
0x1000   :  { %1062 = vmatpush.msrb.mxu2 %v1992_v3 }
0x1002   :  { %1063 = vmatpush.msrb.mxu2 %v1996_v4 }
0x1004   :  { %v918_v60 = vpop.permute.xlu1 %917  ;;  %v778_v61 = vld [vmem:[#allocation3 + $0x30] sm:$0xff]  ;;  %1064 = vmatpush.msrb.mxu2 %v2000_v9 }
0x1005   :  { %1446 = vmatmul.msk.f32.gmra.mxu3 %vm220_vm5, %v778_v61  ;;  %1449 = vmatmul.msk.f32.vlgmr.msra.gmra.mxu2 %vm220_vm5, %v918_v60  ;;  %v833_v60 = vpop.f32.mrf.mxu3 }
0x1006   :  { %1189 = vmatpush.msra.mxu2 %v1990_v1  ;;  %v834_v61 = vadd.f32 %v2023_v15, %v833_v60 }
0x1008   :  { %1190 = vmatpush.msra.mxu2 %v1992_v3 }
0x100a   :  { %1191 = vmatpush.msra.mxu2 %v1996_v4 }
0x100c   :  { %1192 = vmatpush.msra.mxu2 %v2000_v9 }
0x1080   :  { %v2050_v62 = vpop.f32.mrf.mxu2 }
0x1088   :  { %v938_v11 = vpop.f32.mrf.mxu2 }
0x1089   :  { %v941_v12 = vadd.f32 %v938_v11, %v828_v10 }
0x108b   :  { %1543 = vtanh.f32 %v941_v12  ;;  %v1450_v14 = vmul.f32 -1.442695, %v941_v12 }
0x108d   :  { %1545 = vpow2.f32 %v1450_v14 }
0x1091   :  { %v1544_v13 = vpop.eup %1543 }
0x1092   :  { %964 = vrot.lane.b32.xlu2 %v1544_v13, %s1795_s16 }
0x1093   :  { %v1546_v7 = vpop.eup %1545 }
0x1094   :  { %v945_v16 = vadd.f32 1.0, %v1546_v7 }
0x1096   :  { %1547 = vrcp.f32 %v945_v16  ;;  %v957_v5 = vand.u32 2147483648, %v945_v16  ;;  %vm951_vm6 = vweird.f32 %v945_v16  ;;  %v955_v19 = vand.u32 2147483647, %v945_v16 }
0x1098   :  { %v958_v6 = vor.u32 1.1754944e-38, %v957_v5  ;;  %vm956_vm0 = vcmp.eq.f32.partialorder %v955_v19, 8.507059e+37 }
0x109c   :  { %v1548_v17 = vpop.eup %1547 }
0x109d   :  { %v947_v18 = vmul.f32 %v1548_v17, %v945_v16  ;;  %vm952_vm4 = vweird.f32 %v1548_v17 }
0x109e   :  { %vm953_vm7 = vmor %vm951_vm6, %vm952_vm4 }
0x109f   :  { %v948_v0 = vsub.f32 1.0, %v947_v18 }
0x10a1   :  { %v949_v2 = vmul.f32 %v1548_v17, %v948_v0 }
0x10a3   :  { %v950_v8 = vadd.f32 %v1548_v17, %v949_v2 }
0x10a5   :  { %v954_v20 = vsel %vm953_vm7, %v1548_v17, %v950_v8 }
0x10a6   :  { %v959_v22 = vsel %vm956_vm0, %v958_v6, %v954_v20 }
0x10a7   :  { %v962_v24 = vmul.f32 %v959_v22, %v908_v53 }
0x10ec   :  { %v965_v21 = vpop.permute.xlu2 %964 }
0x10ed   :  { %v967_v23 = vmul.f32 %v965_v21, %v959_v22 }
0x10ef   :  { %969 = vrot.lane.b32.xlu0 %v967_v23, %s1795_s16 }
0x1161   :  { %v970_v25 = vpop.permute.xlu0 %969 }
0x1162   :  { %v972_v26 = vadd.f32 %v970_v25, %v962_v24  ;;  %v836_v25 = vpop.f32.mrf.mxu3 }
0x1164   :  { %1549 = vtanh.f32 %v972_v26 }
0x116a   :  { %v1550_v27 = vpop.eup %1549 }
0x116b   :  { %975 = vrot.lane.b32.xlu1 %v1550_v27, %s1795_s16 }
0x11dd   :  { %v976_v28 = vpop.permute.xlu1 %975 }
0x11de   :  { %v978_v29 = vmul.f32 %v976_v28, %v959_v22 }
0x11e0   :  { %981 = vrot.lane.b32.xlu2 %v978_v29, %s1796_s17 }
0x123a   :  { %v982_v30 = vpop.permute.xlu2 %981 }
0x123b   :  { %1451 = vmatmul.msk.f32.vlgmr.msra.gmra.mxu1 %vm220_vm5, %v982_v30 }
0x123c   :  { %1253 = vmatpush.msra.mxu1 %v1990_v1 }
0x123e   :  { %1254 = vmatpush.msra.mxu1 %v1992_v3 }
0x1240   :  { %1255 = vmatpush.msra.mxu1 %v1996_v4 }
0x1242   :  { %1256 = vmatpush.msra.mxu1 %v2000_v9 }
0x12b8   :  { %v1002_v33 = vpop.f32.mrf.mxu1 }
0x12b9   :  { %v1005_v34 = vadd.f32 %v1002_v33, %v831_v32 }
0x12bb   :  { %1551 = vtanh.f32 %v1005_v34  ;;  %v1452_v36 = vmul.f32 -1.442695, %v1005_v34 }
0x12bd   :  { %1553 = vpow2.f32 %v1452_v36 }
0x12c1   :  { %v1552_v35 = vpop.eup %1551 }
0x12c2   :  { %1028 = vrot.lane.b32.xlu0 %v1552_v35, %s1795_s16 }
0x12c3   :  { %v1554_v37 = vpop.eup %1553 }
0x12c4   :  { %v1009_v39 = vadd.f32 1.0, %v1554_v37 }
0x12c6   :  { %1555 = vrcp.f32 %v1009_v39  ;;  %v1021_v45 = vand.u32 2147483648, %v1009_v39  ;;  %vm1015_vm9 = vweird.f32 %v1009_v39  ;;  %v1019_v46 = vand.u32 2147483647, %v1009_v39 }
0x12c8   :  { %v1022_v48 = vor.u32 1.1754944e-38, %v1021_v45  ;;  %vm1020_vm11 = vcmp.eq.f32.partialorder %v1019_v46, 8.507059e+37 }
0x12cc   :  { %v1556_v40 = vpop.eup %1555 }
0x12cd   :  { %v1011_v41 = vmul.f32 %v1556_v40, %v1009_v39  ;;  %vm1016_vm8 = vweird.f32 %v1556_v40 }
0x12ce   :  { %vm1017_vm10 = vmor %vm1015_vm9, %vm1016_vm8 }
0x12cf   :  { %v1012_v42 = vsub.f32 1.0, %v1011_v41 }
0x12d1   :  { %v1013_v43 = vmul.f32 %v1556_v40, %v1012_v42 }
0x12d3   :  { %v1014_v44 = vadd.f32 %v1556_v40, %v1013_v43 }
0x12d5   :  { %v1018_v47 = vsel %vm1017_vm10, %v1556_v40, %v1014_v44 }
0x12d6   :  { %v1023_v51 = vsel %vm1020_vm11, %v1022_v48, %v1018_v47 }
0x12d7   :  { %v1026_v53 = vmul.f32 %v1023_v51, %v972_v26  ;;  %v837_v26 = vadd.f32 %v2023_v15, %v836_v25 }
0x1334   :  { %v1029_v50 = vpop.permute.xlu0 %1028 }
0x1335   :  { %v1031_v52 = vmul.f32 %v1029_v50, %v1023_v51 }
0x1337   :  { %1033 = vrot.lane.b32.xlu1 %v1031_v52, %s1795_s16 }
0x13a9   :  { %v1034_v54 = vpop.permute.xlu1 %1033 }
0x13aa   :  { %v1036_v55 = vadd.f32 %v1034_v54, %v1026_v53  ;;  %v839_v54 = vpop.f32.mrf.mxu3 }
0x13ac   :  { %1557 = vtanh.f32 %v1036_v55 }
0x13b2   :  { %v1558_v56 = vpop.eup %1557 }
0x13b3   :  { %1039 = vrot.lane.b32.xlu2 %v1558_v56, %s1795_s16 }
0x140d   :  { %v1040_v57 = vpop.permute.xlu2 %1039 }
0x140e   :  { %v1042_v58 = vmul.f32 %v1040_v57, %v1023_v51 }
0x1410   :  { %1045 = vrot.lane.b32.xlu0 %v1042_v58, %s1796_s17 }
0x1482   :  { %v1046_v59 = vpop.permute.xlu0 %1045 }
0x1483   :  { %1453 = vmatmul.msk.f32.vlgmr.msrb.gmra.mxu2 %vm220_vm5, %v1046_v59 }
0x1484   :  { %1317 = vmatpush.msrb.mxu2 %v1990_v1 }
0x1486   :  { %1318 = vmatpush.msrb.mxu2 %v1992_v3 }
0x1488   :  { %1319 = vmatpush.msrb.mxu2 %v1996_v4 }
0x148a   :  { %1320 = vmatpush.msrb.mxu2 %v2000_v9 }
0x1506   :  { %v1066_v63 = vpop.f32.mrf.mxu2 }
0x1507   :  { %v1069_v10 = vadd.f32 %v1066_v63, %v834_v61 }
0x1509   :  { %1559 = vtanh.f32 %v1069_v10  ;;  %v1454_v12 = vmul.f32 -1.442695, %v1069_v10 }
0x150b   :  { %1561 = vpow2.f32 %v1454_v12 }
0x150f   :  { %v1560_v11 = vpop.eup %1559 }
0x1510   :  { %1092 = vrot.lane.b32.xlu1 %v1560_v11, %s1795_s16 }
0x1511   :  { %v1562_v13 = vpop.eup %1561 }
0x1512   :  { %v1073_v14 = vadd.f32 1.0, %v1562_v13 }
0x1514   :  { %1563 = vrcp.f32 %v1073_v14  ;;  %v1085_v9 = vand.u32 2147483648, %v1073_v14  ;;  %vm1079_vm13 = vweird.f32 %v1073_v14  ;;  %v1083_v17 = vand.u32 2147483647, %v1073_v14 }
0x1516   :  { %v1086_v0 = vor.u32 1.1754944e-38, %v1085_v9  ;;  %vm1084_vm15 = vcmp.eq.f32.partialorder %v1083_v17, 8.507059e+37 }
0x151a   :  { %v1564_v1 = vpop.eup %1563 }
0x151b   :  { %v1075_v3 = vmul.f32 %v1564_v1, %v1073_v14  ;;  %vm1080_vm12 = vweird.f32 %v1564_v1 }
0x151c   :  { %vm1081_vm14 = vmor %vm1079_vm13, %vm1080_vm12 }
0x151d   :  { %v1076_v7 = vsub.f32 1.0, %v1075_v3 }
0x151f   :  { %v1077_v4 = vmul.f32 %v1564_v1, %v1076_v7  ;;  %v1607_v7 = vld [vmem:[%s2127_s3] ss:$0 sm:$0xff] }
0x1521   :  { %v1078_v16 = vadd.f32 %v1564_v1, %v1077_v4  ;;  %v209_v4 = vadd.f32 %v1607_v7, %v1980_v38 }
0x1523   :  { %v1082_v18 = vsel %vm1081_vm14, %v1564_v1, %v1078_v16  ;;  %v719_v9 = vadd.f32 %v2050_v62, %v209_v4 }
0x1524   :  { %v1087_v8 = vsel %vm1084_vm15, %v1086_v0, %v1082_v18 }
0x1525   :  { %v1090_v19 = vmul.f32 %v1087_v8, %v1036_v55  ;;  %v840_v55 = vadd.f32 %v2023_v15, %v839_v54 }
0x1582   :  { %v1093_v2 = vpop.permute.xlu1 %1092 }
0x1583   :  { %v1095_v5 = vmul.f32 %v1093_v2, %v1087_v8 }
0x1585   :  { %1097 = vrot.lane.b32.xlu2 %v1095_v5, %s1795_s16 }
0x15df   :  { %v1098_v20 = vpop.permute.xlu2 %1097 }
0x15e0   :  { %v1100_v6 = vadd.f32 %v1098_v20, %v1090_v19  ;;  %v1439_v20 = vmul.f32 -1.442695, %v719_v9 }
0x15e2   :  { %1565 = vtanh.f32 %v1100_v6 }
0x15e8   :  { %v1566_v21 = vpop.eup %1565 }
0x15e9   :  { %1103 = vrot.lane.b32.xlu0 %v1566_v21, %s1795_s16 }
0x165b   :  { %v1104_v22 = vpop.permute.xlu0 %1103 }
0x165c   :  { %v1106_v23 = vmul.f32 %v1104_v22, %v1087_v8 }
0x165e   :  { %1109 = vrot.lane.b32.xlu1 %v1106_v23, %s1796_s17 }
0x16d0   :  { %v1110_v24 = vpop.permute.xlu1 %1109 }
0x16d1   :  { %1455 = vmatmul.msk.f32.vlgmr.msrb.gmra.mxu1 %vm220_vm5, %v1110_v24 }
0x174e   :  { %v1130_v27 = vpop.f32.mrf.mxu1 }
0x174f   :  { %v1133_v28 = vadd.f32 %v1130_v27, %v837_v26 }
0x1751   :  { %1567 = vtanh.f32 %v1133_v28  ;;  %v1456_v30 = vmul.f32 -1.442695, %v1133_v28 }
0x1753   :  { %1569 = vpow2.f32 %v1456_v30 }
0x1757   :  { %v1568_v29 = vpop.eup %1567 }
0x1758   :  { %1156 = vrot.lane.b32.xlu2 %v1568_v29, %s1795_s16 }
0x1759   :  { %v1570_v31 = vpop.eup %1569 }
0x175a   :  { %v1137_v32 = vadd.f32 1.0, %v1570_v31 }
0x175c   :  { %1571 = vrcp.f32 %v1137_v32  ;;  %v1149_v39 = vand.u32 2147483648, %v1137_v32  ;;  %vm1143_vm2 = vweird.f32 %v1137_v32  ;;  %v1147_v40 = vand.u32 2147483647, %v1137_v32 }
0x175e   :  { %v1150_v42 = vor.u32 1.1754944e-38, %v1149_v39  ;;  %vm1148_vm4 = vcmp.eq.f32.partialorder %v1147_v40, 8.507059e+37 }
0x1762   :  { %v1572_v33 = vpop.eup %1571 }
0x1763   :  { %v1139_v34 = vmul.f32 %v1572_v33, %v1137_v32  ;;  %vm1144_vm1 = vweird.f32 %v1572_v33 }
0x1764   :  { %vm1145_vm3 = vmor %vm1143_vm2, %vm1144_vm1 }
0x1765   :  { %v1140_v35 = vsub.f32 1.0, %v1139_v34 }
0x1767   :  { %v1141_v36 = vmul.f32 %v1572_v33, %v1140_v35 }
0x1769   :  { %v1142_v37 = vadd.f32 %v1572_v33, %v1141_v36  ;;  %v842_v36 = vpop.f32.mrf.mxu3 }
0x176b   :  { %v1146_v41 = vsel %vm1145_vm3, %v1572_v33, %v1142_v37  ;;  %v843_v37 = vadd.f32 %v2023_v15, %v842_v36 }
0x176c   :  { %v1151_v44 = vsel %vm1148_vm4, %v1150_v42, %v1146_v41 }
0x176d   :  { %v1154_v46 = vmul.f32 %v1151_v44, %v1100_v6 }
0x17b2   :  { %v1157_v43 = vpop.permute.xlu2 %1156 }
0x17b3   :  { %v1159_v45 = vmul.f32 %v1157_v43, %v1151_v44 }
0x17b5   :  { %1161 = vrot.lane.b32.xlu0 %v1159_v45, %s1795_s16 }
0x1827   :  { %v1162_v47 = vpop.permute.xlu0 %1161 }
0x1828   :  { %v1164_v48 = vadd.f32 %v1162_v47, %v1154_v46 }
0x182a   :  { %1573 = vtanh.f32 %v1164_v48 }
0x1830   :  { %v1574_v50 = vpop.eup %1573 }
0x1831   :  { %1167 = vrot.lane.b32.xlu1 %v1574_v50, %s1795_s16 }
0x18a3   :  { %v1168_v51 = vpop.permute.xlu1 %1167 }
0x18a4   :  { %v1170_v52 = vmul.f32 %v1168_v51, %v1151_v44 }
0x18a6   :  { %1173 = vrot.lane.b32.xlu2 %v1170_v52, %s1796_s17 }
0x1900   :  { %v1174_v53 = vpop.permute.xlu2 %1173 }
0x1901   :  { %1457 = vmatmul.msk.f32.vlgmr.msra.gmra.mxu2 %vm220_vm5, %v1174_v53 }
0x1984   :  { %v1194_v56 = vpop.f32.mrf.mxu2 }
0x1985   :  { %v1197_v57 = vadd.f32 %v1194_v56, %v840_v55 }
0x1987   :  { %1575 = vtanh.f32 %v1197_v57  ;;  %v1458_v59 = vmul.f32 -1.442695, %v1197_v57 }
0x1989   :  { %1577 = vpow2.f32 %v1458_v59 }
0x198d   :  { %v1576_v58 = vpop.eup %1575 }
0x198e   :  { %1220 = vrot.lane.b32.xlu0 %v1576_v58, %s1795_s16 }
0x198f   :  { %v1578_v60 = vpop.eup %1577 }
0x1990   :  { %v1201_v61 = vadd.f32 1.0, %v1578_v60 }
0x1992   :  { %1579 = vrcp.f32 %v1201_v61  ;;  %v1213_v14 = vand.u32 2147483648, %v1201_v61  ;;  %vm1207_vm7 = vweird.f32 %v1201_v61  ;;  %v1211_v1 = vand.u32 2147483647, %v1201_v61 }
0x1993   :  { %1581 = vtanh.f32 %v719_v9 }
0x1994   :  { %v1214_v16 = vor.u32 1.1754944e-38, %v1213_v14  ;;  %vm1212_vm8 = vcmp.eq.f32.partialorder %v1211_v1, 8.507059e+37 }
0x1998   :  { %v1580_v63 = vpop.eup %1579 }
0x1999   :  { %v1203_v10 = vmul.f32 %v1580_v63, %v1201_v61  ;;  %vm1208_vm6 = vweird.f32 %v1580_v63  ;;  %v1582_v2 = vpop.eup %1581 }
0x199a   :  { %vm1209_vm0 = vmor %vm1207_vm7, %vm1208_vm6 }
0x199b   :  { %v1204_v11 = vsub.f32 1.0, %v1203_v10 }
0x199d   :  { %v1205_v12 = vmul.f32 %v1580_v63, %v1204_v11 }
0x199f   :  { %v1206_v13 = vadd.f32 %v1580_v63, %v1205_v12 }
0x19a1   :  { %v1210_v3 = vsel %vm1209_vm0, %v1580_v63, %v1206_v13 }
0x19a2   :  { %v1215_v18 = vsel %vm1212_vm8, %v1214_v16, %v1210_v3 }
0x19a3   :  { %v1218_v8 = vmul.f32 %v1215_v18, %v1164_v48 }
0x1a00   :  { %v1221_v17 = vpop.permute.xlu0 %1220 }
0x1a01   :  { %v1223_v0 = vmul.f32 %v1221_v17, %v1215_v18 }
0x1a03   :  { %1225 = vrot.lane.b32.xlu1 %v1223_v0, %s1795_s16 }
0x1a0b   :  { %742 = vrot.lane.b32.xlu1 %v1582_v2, %s1795_s16 }
0x1a75   :  { %v1226_v5 = vpop.permute.xlu1 %1225 }
0x1a76   :  { %v2093_v19 = vadd.f32 %v1226_v5, %v1218_v8 }
0x1a78   :  { %1583 = vtanh.f32 %v2093_v19 }
0x1a79   :  { %1585 = vpow2.f32 %v1439_v20 }
0x1a7d   :  { %v743_v32 = vpop.permute.xlu1 %742 }
0x1a7e   :  { %v1584_v38 = vpop.eup %1583 }
0x1a7f   :  { %1231 = vrot.lane.b32.xlu2 %v1584_v38, %s1795_s16  ;;  %v1586_v62 = vpop.eup %1585 }
0x1a80   :  { %v723_v6 = vadd.f32 1.0, %v1586_v62 }
0x1a82   :  { %1587 = vrcp.f32 %v723_v6  ;;  %v735_v28 = vand.u32 2147483648, %v723_v6  ;;  %vm729_vm10 = vweird.f32 %v723_v6  ;;  %v733_v29 = vand.u32 2147483647, %v723_v6 }
0x1a84   :  { %v736_v31 = vor.u32 1.1754944e-38, %v735_v28  ;;  %vm734_vm12 = vcmp.eq.f32.partialorder %v733_v29, 8.507059e+37 }
0x1a88   :  { %v1588_v21 = vpop.eup %1587 }
0x1a89   :  { %v725_v22 = vmul.f32 %v1588_v21, %v723_v6  ;;  %vm730_vm9 = vweird.f32 %v1588_v21 }
0x1a8a   :  { %vm731_vm11 = vmor %vm729_vm10, %vm730_vm9 }
0x1a8b   :  { %v726_v23 = vsub.f32 1.0, %v725_v22 }
0x1a8d   :  { %v727_v24 = vmul.f32 %v1588_v21, %v726_v23 }
0x1a8f   :  { %v728_v26 = vadd.f32 %v1588_v21, %v727_v24 }
0x1a91   :  { %v732_v30 = vsel %vm731_vm11, %v1588_v21, %v728_v26 }
0x1a92   :  { %v737_v33 = vsel %vm734_vm12, %v736_v31, %v732_v30  ;;  %v1366_v31 = vld [vmem:[#allocation13 + $0x18] sm:$0xff] }
0x1a93   :  { %v745_v34 = vmul.f32 %v743_v32, %v737_v33  ;;  %v740_v42 = vmul.f32 %v737_v33, %v2031_v49  ;;  %v1365_v32 = vld [vmem:[#allocation13 + $0x10] sm:$0xff]  ;;  %1388 = vmatpush.msrb.mxu1 %v1366_v31 }
0x1a95   :  { %1389 = vmatpush.msrb.mxu1 %v1365_v32 }
0x1ad9   :  { %v1232_v25 = vpop.permute.xlu2 %1231 }
0x1ada   :  { %v1234_v27 = vmul.f32 %v1232_v25, %v1215_v18 }
0x1adc   :  { %1237 = vrot.lane.b32.xlu0 %v1234_v27, %s1796_s17 }
0x1ae4   :  { %747 = vrot.lane.b32.xlu0 %v745_v34, %s1795_s16  ;;  %v1363_v34 = vld [vmem:[#allocation13] sm:$0xff] }
0x1b4e   :  { %v1238_v35 = vpop.permute.xlu0 %1237 }
0x1b4f   :  { %1459 = vmatmul.msk.f32.vlgmr.msra.gmra.mxu1 %vm220_vm5, %v1238_v35 }
0x1b56   :  { %v748_v41 = vpop.permute.xlu0 %747 }
0x1b57   :  { %v750_v43 = vadd.f32 %v748_v41, %v740_v42 }
0x1bcc   :  { %v1258_v39 = vpop.f32.mrf.mxu1 }
0x1bcd   :  { %v1261_v40 = vadd.f32 %v1258_v39, %v843_v37  ;;  %v1478_v39 = vld [vmem:[%s2132_s8] ss:$0 sm:$0xff] }
0x1bcf   :  { %1589 = vtanh.f32 %v1261_v40  ;;  %v1460_v46 = vmul.f32 -1.442695, %v1261_v40 }
0x1bd0   :  { %1591 = vtanh.f32 %v750_v43 }
0x1bd1   :  { %1593 = vpow2.f32 %v1460_v46 }
0x1bd5   :  { %v1590_v44 = vpop.eup %1589 }
0x1bd6   :  { %1284 = vrot.lane.b32.xlu2 %v1590_v44, %s1795_s16  ;;  %v1592_v45 = vpop.eup %1591 }
0x1bd7   :  { %v1594_v47 = vpop.eup %1593 }
0x1bd8   :  { %v1265_v48 = vadd.f32 1.0, %v1594_v47 }
0x1bda   :  { %1595 = vrcp.f32 %v1265_v48  ;;  %v1277_v49 = vand.u32 2147483648, %v1265_v48  ;;  %vm1271_vm14 = vweird.f32 %v1265_v48  ;;  %v1275_v55 = vand.u32 2147483647, %v1265_v48 }
0x1bdc   :  { %v1278_v57 = vor.u32 1.1754944e-38, %v1277_v49  ;;  %vm1276_vm1 = vcmp.eq.f32.partialorder %v1275_v55, 8.507059e+37 }
0x1bde   :  { %753 = vrot.lane.b32.xlu2 %v1592_v45, %s1795_s16 }
0x1be0   :  { %v1596_v50 = vpop.eup %1595 }
0x1be1   :  { %v1267_v51 = vmul.f32 %v1596_v50, %v1265_v48  ;;  %vm1272_vm13 = vweird.f32 %v1596_v50 }
0x1be2   :  { %vm1273_vm15 = vmor %vm1271_vm14, %vm1272_vm13 }
0x1be3   :  { %v1268_v52 = vsub.f32 1.0, %v1267_v51 }
0x1be5   :  { %v1269_v53 = vmul.f32 %v1596_v50, %v1268_v52 }
0x1be7   :  { %v1270_v54 = vadd.f32 %v1596_v50, %v1269_v53 }
0x1be9   :  { %v1274_v56 = vsel %vm1273_vm15, %v1596_v50, %v1270_v54 }
0x1bea   :  { %v1279_v59 = vsel %vm1276_vm1, %v1278_v57, %v1274_v56 }
0x1beb   :  { %v1282_v10 = vmul.f32 %v1279_v59, %v2093_v19 }
0x1c30   :  { %v1285_v58 = vpop.permute.xlu2 %1284 }
0x1c31   :  { %v1287_v60 = vmul.f32 %v1285_v58, %v1279_v59 }
0x1c33   :  { %1289 = vrot.lane.b32.xlu1 %v1287_v60, %s1795_s16 }
0x1c38   :  { %v754_v61 = vpop.permute.xlu2 %753 }
0x1c39   :  { %v756_v63 = vmul.f32 %v754_v61, %v737_v33  ;;  %v1364_v33 = vld [vmem:[#allocation13 + $0x8] sm:$0xff] }
0x1c3a   :  { %1390 = vmatpush.msrb.mxu1 %v1364_v33 }
0x1c3b   :  { %758 = vrot.lane.b32.xlu1 %v756_v63, %s1796_s17 }
0x1c3c   :  { %1391 = vmatpush.msrb.mxu1 %v1363_v34 }
0x1ca5   :  { %v1290_v11 = vpop.permute.xlu1 %1289 }
0x1ca6   :  { %v1292_v12 = vadd.f32 %v1290_v11, %v1282_v10 }
0x1ca8   :  { %1597 = vtanh.f32 %v1292_v12 }
0x1cad   :  { %v759_v13 = vpop.permute.xlu1 %758 }
0x1cae   :  { %v1598_v14 = vpop.eup %1597  ;;  %762 = vst.msk [vmem:[#allocation3 + $0x38] sm:$0xff] %vm220_vm5, %v759_v13 }
0x1caf   :  { %1295 = vrot.lane.b32.xlu0 %v1598_v14, %s1795_s16 }
0x1cb5   :  { %v779_v1 = vld [vmem:[#allocation3 + $0x38] sm:$0xff] }
0x1cb6   :  { %1447 = vmatmul.msk.f32.gmra.mxu3 %vm220_vm5, %v779_v1 }
0x1d21   :  { %v1296_v3 = vpop.permute.xlu0 %1295 }
0x1d22   :  { %v1298_v7 = vmul.f32 %v1296_v3, %v1279_v59 }
0x1d24   :  { %1301 = vrot.lane.b32.xlu2 %v1298_v7, %s1796_s17 }
0x1d39   :  { %v845_v16 = vpop.f32.mrf.mxu3 }
0x1d3a   :  { %v846_v9 = vadd.f32 %v2023_v15, %v845_v16 }
0x1d7e   :  { %v1302_v4 = vpop.permute.xlu2 %1301 }
0x1d7f   :  { %1461 = vmatmul.msk.f32.vlgmr.msrb.gmra.mxu2 %vm220_vm5, %v1302_v4 }
0x1e02   :  { %v1322_v17 = vpop.f32.mrf.mxu2 }
0x1e03   :  { %v1325_v18 = vadd.f32 %v1322_v17, %v846_v9 }
0x1e05   :  { %1599 = vtanh.f32 %v1325_v18  ;;  %v1462_v2 = vmul.f32 -1.442695, %v1325_v18 }
0x1e07   :  { %1601 = vpow2.f32 %v1462_v2 }
0x1e0b   :  { %v1600_v0 = vpop.eup %1599 }
0x1e0c   :  { %1348 = vrot.lane.b32.xlu0 %v1600_v0, %s1795_s16 }
0x1e0d   :  { %v1602_v8 = vpop.eup %1601 }
0x1e0e   :  { %v1329_v5 = vadd.f32 1.0, %v1602_v8 }
0x1e10   :  { %1603 = vrcp.f32 %v1329_v5  ;;  %v1341_v21 = vand.u32 2147483648, %v1329_v5  ;;  %vm1335_vm3 = vweird.f32 %v1329_v5  ;;  %v1339_v15 = vand.u32 2147483647, %v1329_v5 }
0x1e12   :  { %v1342_v23 = vor.u32 1.1754944e-38, %v1341_v21  ;;  %vm1340_vm6 = vcmp.eq.f32.partialorder %v1339_v15, 8.507059e+37 }
0x1e16   :  { %v1604_v19 = vpop.eup %1603 }
0x1e17   :  { %v1331_v38 = vmul.f32 %v1604_v19, %v1329_v5  ;;  %vm1336_vm2 = vweird.f32 %v1604_v19 }
0x1e18   :  { %vm1337_vm4 = vmor %vm1335_vm3, %vm1336_vm2 }
0x1e19   :  { %v1332_v20 = vsub.f32 1.0, %v1331_v38 }
0x1e1b   :  { %v1333_v62 = vmul.f32 %v1604_v19, %v1332_v20 }
0x1e1d   :  { %v1334_v6 = vadd.f32 %v1604_v19, %v1333_v62 }
0x1e1f   :  { %v1338_v22 = vsel %vm1337_vm4, %v1604_v19, %v1334_v6 }
0x1e20   :  { %v1343_v25 = vsel %vm1340_vm6, %v1342_v23, %v1338_v22 }
0x1e21   :  { %v1346_v27 = vmul.f32 %v1343_v25, %v1292_v12 }
0x1e7e   :  { %v1349_v24 = vpop.permute.xlu0 %1348 }
0x1e7f   :  { %v1351_v26 = vmul.f32 %v1349_v24, %v1343_v25 }
0x1e81   :  { %1353 = vrot.lane.b32.xlu1 %v1351_v26, %s1795_s16 }
0x1ef3   :  { %v1354_v28 = vpop.permute.xlu1 %1353 }
0x1ef4   :  { %v1356_v29 = vadd.f32 %v1354_v28, %v1346_v27 }
0x1ef6   :  { %1605 = vtanh.f32 %v1356_v29 }
0x1efc   :  { %v1606_v30 = vpop.eup %1605 }
0x1efd   :  { %1359 = vrot.lane.b32.xlu2 %v1606_v30, %s1795_s16 }
0x1f57   :  { %v1360_v35 = vpop.permute.xlu2 %1359 }
0x1f58   :  { %v1362_v36 = vmul.f32 %v1360_v35, %v1343_v25 }
0x1f5a   :  { %1372 = vrot.lane.b32.xlu0 %v1362_v36, %s1796_s17 }
0x1fcc   :  { %v1373_v37 = vpop.permute.xlu0 %1372 }
0x1fcd   :  { %1463 = vmatmul.msk.f32.vlgmr.msrb.gmra.mxu1 %vm220_vm5, %v1373_v37 }
0x204a   :  { %v1393_v40 = vpop.f32.mrf.mxu1 }
0x204b   :  { %v1394_v41 = vadd.f32 %v1478_v39, %v1393_v40 }
0x204d   :  { %1396 = vst [vmem:[#allocation15] sm:$0xff] %v1394_v41 }
0x204e   :  { %1407 = dma.vmem_to_hbm [thread:$0]  %s1403_s1, 128, %s1405_s24, [#allocation6]  }
0x204f   :  { %1784 = dma.done.wait [#allocation6], 128  }
0x2050   :  { %1785 = vsyncadd [#allocation6], 4294967168 }
0x2051   :  { %1412 = vsyncpa [#allocation5], 1 }
0x2052   :  { %1413 = vsyncpa [#allocation8], 1 }
0x2053   :  { %1414 = vsyncpa [#allocation11], 1 }
0x2054   :  { %1415 = vsyncpa [#allocation14], 1 }
0x2055   :  { %1416 = vsyncpa [#allocation6], 1 }

</bundles_post_ra>
